<compile_context>
chip_gen: v5e
topology: v5e:2x2
jax: 0.10.0
libtpu: 0.0.40
codegen_flags: <defaults>
</compile_context>

<pallas_src>
import math
import jax
import jax.numpy as jnp
from jax.experimental import pallas as pl
from jax.experimental.pallas import tpu as pltpu

HIDDEN_SZ = 20          # module default hidden_sz
GATE_PAD = 32           # per-gate row padding -> 4 * 32 = 128 gate rows (one sublane tile)


def _round_up(x, m):
    return (x + m - 1) // m * m


def _optimizer_kernel(x_ref, h0_ref, c0_ref, h1_ref, c1_ref,
                      wih1_ref, whh1_ref, b1_ref,
                      wih2_ref, whh2_ref, b2_ref,
                      wout_ref, bout_ref,
                      out_ref, h0o_ref, c0o_ref, h1o_ref, c1o_ref):
    H = h0_ref.shape[0]              # true hidden size (20)
    HP = b1_ref.shape[0] // 4        # padded per-gate stride (32) -> aligned gate slices

    def lstm_gates(gates, c):
        # gate order [i, f, g, o] matches torch.nn.LSTMCell.
        i = jax.nn.sigmoid(gates[0 * HP:0 * HP + H, :])
        f = jax.nn.sigmoid(gates[1 * HP:1 * HP + H, :])
        g = jnp.tanh(gates[2 * HP:2 * HP + H, :])
        o = jax.nn.sigmoid(gates[3 * HP:3 * HP + H, :])
        c_new = f * c + i * g
        h_new = o * jnp.tanh(c_new)
        return h_new, c_new

    x = x_ref[...]                   # (1, TN)  gradient value per coordinate (lane-dense)

    # --- Cell 1: input dim is 1, so the rank-1 contribution is a VPU broadcast
    # multiply (a K=1 MXU matmul would be pure fill/drain overhead). -------------
    g1 = (wih1_ref[...] * x
          + jnp.dot(whh1_ref[...], h0_ref[...], preferred_element_type=jnp.float32)
          + b1_ref[...])
    h0n, c0n = lstm_gates(g1, c0_ref[...])

    # --- Cell 2: two K=H matmuls against resident weight tiles.  (Fusing them
    # into one K=2H matmul would need a sublane-misaligned concat of h0n/h1 that
    # costs about as much as the saved MXU pass on this HBM-bound kernel.) ------
    g2 = (jnp.dot(wih2_ref[...], h0n, preferred_element_type=jnp.float32)
          + jnp.dot(whh2_ref[...], h1_ref[...], preferred_element_type=jnp.float32)
          + b2_ref[...])
    h1n, c1n = lstm_gates(g2, c1_ref[...])

    # --- Output projection Linear(H, 1): broadcast-mul + sublane reduce (XLU),
    # result is a lane-dense (1, TN) slab -> unmasked full-width stores. --------
    out_ref[...] = (jnp.sum(wout_ref[...] * h1n, axis=0, keepdims=True)
                    + bout_ref[...])
    h0o_ref[...] = h0n
    c0o_ref[...] = c0n
    h1o_ref[...] = h1n
    c1o_ref[...] = c1n


def _pack_params(params, H):
    """Pad per-gate weight rows H->GATE_PAD so 4H gate rows become 128 (aligned)."""
    HP = GATE_PAD
    GP = 4 * HP

    def pad_gate_rows(w):
        # w: (4H, K) -> (GP, K); gate g's rows land at [g*HP : g*HP+H].
        K = w.shape[1]
        out = jnp.zeros((GP, K), jnp.float32)
        for g in range(4):
            out = out.at[g * HP:g * HP + H, :].set(w[g * H:(g + 1) * H, :])
        return out

    b1 = (params["b_ih1"] + params["b_hh1"]).reshape(4 * H, 1)
    b2 = (params["b_ih2"] + params["b_hh2"]).reshape(4 * H, 1)
    return {
        "wih1": pad_gate_rows(params["w_ih1"]),   # (128, 1)
        "whh1": pad_gate_rows(params["w_hh1"]),   # (128, H)
        "b1":   pad_gate_rows(b1),                # (128, 1)
        "wih2": pad_gate_rows(params["w_ih2"]),   # (128, H)
        "whh2": pad_gate_rows(params["w_hh2"]),   # (128, H)
        "b2":   pad_gate_rows(b2),                # (128, 1)
        "wout": params["w_out"].T,                # (H, 1)
        "bout": params["b_out"].reshape(1, 1),    # (1, 1)
    }


def optimizer_forward(inp, states, params, *, block_n=2048):
    """inp: (N, 1) f32; states: ((h0, c0), (h1, c1)) each (N, H) f32.

    Returns (update, ((h0', c0'), (h1', c1'))) like Optimizer.forward.
    Internally the kernel runs in a lane-dense (feature, N) layout tiled over N.
    """
    (h0, c0), (h1, c1) = states
    N = inp.shape[0]
    H = h0.shape[1]
    GP = 4 * GATE_PAD

    # ---- lane-dense repack: coordinates (N) go on the lane axis -------------
    NP = max(_round_up(N, 128), 128)
    TN = min(block_n, NP)        # tile must be a multiple of 128 (lane width)
    NP = _round_up(NP, TN)
    grid = (NP // TN,)

    def to_td(a):                # (N, F) -> (F, NP), zero-padded tail columns
        return jnp.pad(a.T, ((0, 0), (0, NP - N)))

    x_td = to_td(inp)                                   # (1, NP)
    h0t, c0t, h1t, c1t = map(to_td, (h0, c0, h1, c1))   # (H, NP) each

    p = _pack_params(params, H)

    state_spec = pl.BlockSpec((H, TN), lambda i: (0, i))
    x_spec = pl.BlockSpec((1, TN), lambda i: (0, i))
    out_spec = pl.BlockSpec((1, TN), lambda i: (0, i))

    def const_spec(shape):       # weights: resident across all grid steps
        return pl.BlockSpec(shape, lambda i: (0, 0))

    in_specs = [
        x_spec, state_spec, state_spec, state_spec, state_spec,
        const_spec((GP, 1)), const_spec((GP, H)), const_spec((GP, 1)),
        const_spec((GP, H)), const_spec((GP, H)), const_spec((GP, 1)),
        const_spec((H, 1)), const_spec((1, 1)),
    ]
    out_specs = (out_spec, state_spec, state_spec, state_spec, state_spec)
    out_shape = (
        jax.ShapeDtypeStruct((1, NP), jnp.float32),
        jax.ShapeDtypeStruct((H, NP), jnp.float32),
        jax.ShapeDtypeStruct((H, NP), jnp.float32),
        jax.ShapeDtypeStruct((H, NP), jnp.float32),
        jax.ShapeDtypeStruct((H, NP), jnp.float32),
    )

    out_td, h0n, c0n, h1n, c1n = pl.pallas_call(
        _optimizer_kernel,
        grid=grid,
        in_specs=in_specs,
        out_specs=out_specs,
        out_shape=out_shape,
        # in-place state update: new states overwrite the (freshly packed) inputs
        input_output_aliases={1: 1, 2: 2, 3: 3, 4: 4},
        compiler_params=pltpu.CompilerParams(
            dimension_semantics=("parallel",)),
    )(x_td, h0t, c0t, h1t, c1t,
      p["wih1"], p["whh1"], p["b1"],
      p["wih2"], p["whh2"], p["b2"],
      p["wout"], p["bout"])

    un_td = lambda a: a[:, :N].T
    update = un_td(out_td)                               # (N, 1)
    return update, ((un_td(h0n), un_td(c0n)), (un_td(h1n), un_td(c1n)))


def _ref_forward(inp, states, params):
    """Pure-JAX reference mirroring torch.nn.LSTMCell / nn.Linear semantics."""
    def cell(x, h, c, wih, whh, bih, bhh):
        g = x @ wih.T + bih + h @ whh.T + bhh
        H = h.shape[1]
        i = jax.nn.sigmoid(g[:, 0 * H:1 * H])
        f = jax.nn.sigmoid(g[:, 1 * H:2 * H])
        gg = jnp.tanh(g[:, 2 * H:3 * H])
        o = jax.nn.sigmoid(g[:, 3 * H:4 * H])
        c_new = f * c + i * gg
        return o * jnp.tanh(c_new), c_new

    (h0, c0), (h1, c1) = states
    h0n, c0n = cell(inp, h0, c0, params["w_ih1"], params["w_hh1"],
                    params["b_ih1"], params["b_hh1"])
    h1n, c1n = cell(h0n, h1, c1, params["w_ih2"], params["w_hh2"],
                    params["b_ih2"], params["b_hh2"])
    out = h1n @ params["w_out"].T + params["b_out"]
    return out, ((h0n, c0n), (h1n, c1n))


def init_params(key, hidden_sz=HIDDEN_SZ):
    """Deterministic init matching torch default U(-1/sqrt(H), 1/sqrt(H))."""
    H = hidden_sz
    bound = 1.0 / math.sqrt(H)
    keys = jax.random.split(key, 10)

    def u(k, shape):
        return jax.random.uniform(k, shape, jnp.float32, -bound, bound)

    return {
        # LSTMCell(1, H)
        "w_ih1": u(keys[0], (4 * H, 1)),
        "w_hh1": u(keys[1], (4 * H, H)),
        "b_ih1": u(keys[2], (4 * H,)),
        "b_hh1": u(keys[3], (4 * H,)),
        # LSTMCell(H, H)
        "w_ih2": u(keys[4], (4 * H, H)),
        "w_hh2": u(keys[5], (4 * H, H)),
        "b_ih2": u(keys[6], (4 * H,)),
        "b_hh2": u(keys[7], (4 * H,)),
        # Linear(H, 1)
        "w_out": u(keys[8], (1, H)),
        "b_out": u(keys[9], (1,)),
    }


if __name__ == "__main__":
    key = jax.random.PRNGKey(0)
    k_p, k_x, k_h0, k_c0, k_h1, k_c1 = jax.random.split(key, 6)

    H = HIDDEN_SZ   # 20, module default
    N = 300         # number of parameter coordinates (small demo; exercises tail pad)

    params = init_params(k_p, H)
    inp = jax.random.normal(k_x, (N, 1), jnp.float32)          # per-coordinate gradient
    states = (
        (jax.random.normal(k_h0, (N, H), jnp.float32),
         jax.random.normal(k_c0, (N, H), jnp.float32)),
        (jax.random.normal(k_h1, (N, H), jnp.float32),
         jax.random.normal(k_c1, (N, H), jnp.float32)),
    )

    # block_n=128 -> NP=384, grid=(3,): exercises the pipelined N-grid + padding.
    out, new_states = optimizer_forward(inp, states, params, block_n=128)
    jax.block_until_ready(out)
    jax.block_until_ready(new_states)

    # Cross-check against pure-JAX reference.
    out_ref, states_ref = _ref_forward(inp, states, params)
    assert out.shape == (N, 1)
    assert jnp.allclose(out, out_ref, atol=1e-5, rtol=1e-5)
    for (a, b), (ar, br) in zip(new_states, states_ref):
        assert jnp.allclose(a, ar, atol=1e-5, rtol=1e-5)
        assert jnp.allclose(b, br, atol=1e-5, rtol=1e-5)

    # Also run the default (single big tile) configuration once.
    out2, _ = optimizer_forward(inp, states, params)
    jax.block_until_ready(out2)
    assert jnp.allclose(out2, out_ref, atol=1e-5, rtol=1e-5)

    print("KERNEL_OK")
</pallas_src>

<mosaic_0001>
module attributes {stable_mosaic.version = 11 : i64} {
  func.func @_optimizer_kernel(%arg0: i32, %arg1: memref<1x128xf32, #tpu.memory_space<vmem>>, %arg2: memref<20x128xf32, #tpu.memory_space<vmem>>, %arg3: memref<20x128xf32, #tpu.memory_space<vmem>>, %arg4: memref<20x128xf32, #tpu.memory_space<vmem>>, %arg5: memref<20x128xf32, #tpu.memory_space<vmem>>, %arg6: memref<128x1xf32, #tpu.memory_space<vmem>>, %arg7: memref<128x20xf32, #tpu.memory_space<vmem>>, %arg8: memref<128x1xf32, #tpu.memory_space<vmem>>, %arg9: memref<128x20xf32, #tpu.memory_space<vmem>>, %arg10: memref<128x20xf32, #tpu.memory_space<vmem>>, %arg11: memref<128x1xf32, #tpu.memory_space<vmem>>, %arg12: memref<20x1xf32, #tpu.memory_space<vmem>>, %arg13: memref<1x1xf32, #tpu.memory_space<vmem>>, %arg14: memref<1x128xf32, #tpu.memory_space<vmem>>, %arg15: memref<20x128xf32, #tpu.memory_space<vmem>>, %arg16: memref<20x128xf32, #tpu.memory_space<vmem>>, %arg17: memref<20x128xf32, #tpu.memory_space<vmem>>, %arg18: memref<20x128xf32, #tpu.memory_space<vmem>>) attributes {dimension_semantics = [#tpu.dimension_semantics<parallel>], iteration_bounds = array<i64: 3>, scalar_prefetch = 0 : i64, scratch_operands = 0 : i64, tpu.core_type = #tpu.core_type<tc>, window_params = [{transform_indices = @transform_0, window_bounds = array<i64: 1, 128>}, {transform_indices = @transform_1, window_bounds = array<i64: 20, 128>}, {transform_indices = @transform_2, window_bounds = array<i64: 20, 128>}, {transform_indices = @transform_3, window_bounds = array<i64: 20, 128>}, {transform_indices = @transform_4, window_bounds = array<i64: 20, 128>}, {pipeline_mode = #tpu.pipeline_mode<synchronous>, transform_indices = @transform_5, window_bounds = array<i64: 128, 1>}, {pipeline_mode = #tpu.pipeline_mode<synchronous>, transform_indices = @transform_6, window_bounds = array<i64: 128, 20>}, {pipeline_mode = #tpu.pipeline_mode<synchronous>, transform_indices = @transform_7, window_bounds = array<i64: 128, 1>}, {pipeline_mode = #tpu.pipeline_mode<synchronous>, transform_indices = @transform_8, window_bounds = array<i64: 128, 20>}, {pipeline_mode = #tpu.pipeline_mode<synchronous>, transform_indices = @transform_9, window_bounds = array<i64: 128, 20>}, {pipeline_mode = #tpu.pipeline_mode<synchronous>, transform_indices = @transform_10, window_bounds = array<i64: 128, 1>}, {pipeline_mode = #tpu.pipeline_mode<synchronous>, transform_indices = @transform_11, window_bounds = array<i64: 20, 1>}, {pipeline_mode = #tpu.pipeline_mode<synchronous>, transform_indices = @transform_12, window_bounds = array<i64: 1, 1>}, {transform_indices = @transform_13, window_bounds = array<i64: 1, 128>}, {transform_indices = @transform_14, window_bounds = array<i64: 20, 128>}, {transform_indices = @transform_15, window_bounds = array<i64: 20, 128>}, {transform_indices = @transform_16, window_bounds = array<i64: 20, 128>}, {transform_indices = @transform_17, window_bounds = array<i64: 20, 128>}]} {
    %c0 = arith.constant 0 : index
    %c0_0 = arith.constant 0 : index
    %0 = vector.load %arg1[%c0, %c0_0] : memref<1x128xf32, #tpu.memory_space<vmem>>, vector<1x128xf32>
    %c0_1 = arith.constant 0 : index
    %c0_2 = arith.constant 0 : index
    %1 = vector.load %arg6[%c0_1, %c0_2] : memref<128x1xf32, #tpu.memory_space<vmem>>, vector<128x1xf32>
    %2 = vector.broadcast %1 : vector<128x1xf32> to vector<128x128xf32>
    %3 = vector.broadcast %0 : vector<1x128xf32> to vector<128x128xf32>
    %4 = arith.mulf %2, %3 : vector<128x128xf32>
    %c0_3 = arith.constant 0 : index
    %c0_4 = arith.constant 0 : index
    %5 = vector.load %arg7[%c0_3, %c0_4] : memref<128x20xf32, #tpu.memory_space<vmem>>, vector<128x20xf32>
    %c0_5 = arith.constant 0 : index
    %c0_6 = arith.constant 0 : index
    %6 = vector.load %arg2[%c0_5, %c0_6] : memref<20x128xf32, #tpu.memory_space<vmem>>, vector<20x128xf32>
    %cst = arith.constant dense<0.000000e+00> : vector<128x128xf32>
    %7 = tpu.matmul %5, %6, %cst {dimension_numbers = #tpu.dot_dimension_numbers<[1], [0], [0], [1], [0, 0, 1, 1], [], []>} : vector<128x20xf32>, vector<20x128xf32>, vector<128x128xf32> -> vector<128x128xf32>
    %8 = arith.addf %4, %7 : vector<128x128xf32>
    %c0_7 = arith.constant 0 : index
    %c0_8 = arith.constant 0 : index
    %9 = vector.load %arg8[%c0_7, %c0_8] : memref<128x1xf32, #tpu.memory_space<vmem>>, vector<128x1xf32>
    %10 = vector.broadcast %9 : vector<128x1xf32> to vector<128x128xf32>
    %11 = arith.addf %8, %10 : vector<128x128xf32>
    %c0_9 = arith.constant 0 : index
    %c0_10 = arith.constant 0 : index
    %12 = vector.load %arg3[%c0_9, %c0_10] : memref<20x128xf32, #tpu.memory_space<vmem>>, vector<20x128xf32>
    %13 = vector.extract_strided_slice %11 {offsets = [0, 0], sizes = [20, 128], strides = [1, 1]} : vector<128x128xf32> to vector<20x128xf32>
    %14 = arith.negf %13 : vector<20x128xf32>
    %15 = math.exp %14 : vector<20x128xf32>
    %cst_11 = arith.constant 1.000000e+00 : f32
    %16 = vector.broadcast %cst_11 : f32 to vector<20x128xf32>
    %17 = arith.addf %16, %15 : vector<20x128xf32>
    %18 = arith.divf %16, %17 : vector<20x128xf32>
    %19 = vector.extract_strided_slice %11 {offsets = [32, 0], sizes = [20, 128], strides = [1, 1]} : vector<128x128xf32> to vector<20x128xf32>
    %20 = arith.negf %19 : vector<20x128xf32>
    %21 = math.exp %20 : vector<20x128xf32>
    %cst_12 = arith.constant 1.000000e+00 : f32
    %22 = vector.broadcast %cst_12 : f32 to vector<20x128xf32>
    %23 = arith.addf %22, %21 : vector<20x128xf32>
    %24 = arith.divf %22, %23 : vector<20x128xf32>
    %25 = vector.extract_strided_slice %11 {offsets = [64, 0], sizes = [20, 128], strides = [1, 1]} : vector<128x128xf32> to vector<20x128xf32>
    %26 = math.tanh %25 : vector<20x128xf32>
    %27 = vector.extract_strided_slice %11 {offsets = [96, 0], sizes = [20, 128], strides = [1, 1]} : vector<128x128xf32> to vector<20x128xf32>
    %28 = arith.negf %27 : vector<20x128xf32>
    %29 = math.exp %28 : vector<20x128xf32>
    %cst_13 = arith.constant 1.000000e+00 : f32
    %30 = vector.broadcast %cst_13 : f32 to vector<20x128xf32>
    %31 = arith.addf %30, %29 : vector<20x128xf32>
    %32 = arith.divf %30, %31 : vector<20x128xf32>
    %33 = arith.mulf %24, %12 : vector<20x128xf32>
    %34 = arith.mulf %18, %26 : vector<20x128xf32>
    %35 = arith.addf %33, %34 : vector<20x128xf32>
    %36 = math.tanh %35 : vector<20x128xf32>
    %37 = arith.mulf %32, %36 : vector<20x128xf32>
    %c0_14 = arith.constant 0 : index
    %c0_15 = arith.constant 0 : index
    %38 = vector.load %arg9[%c0_14, %c0_15] : memref<128x20xf32, #tpu.memory_space<vmem>>, vector<128x20xf32>
    %cst_16 = arith.constant dense<0.000000e+00> : vector<128x128xf32>
    %39 = tpu.matmul %38, %37, %cst_16 {dimension_numbers = #tpu.dot_dimension_numbers<[1], [0], [0], [1], [0, 0, 1, 1], [], []>} : vector<128x20xf32>, vector<20x128xf32>, vector<128x128xf32> -> vector<128x128xf32>
    %c0_17 = arith.constant 0 : index
    %c0_18 = arith.constant 0 : index
    %40 = vector.load %arg10[%c0_17, %c0_18] : memref<128x20xf32, #tpu.memory_space<vmem>>, vector<128x20xf32>
    %c0_19 = arith.constant 0 : index
    %c0_20 = arith.constant 0 : index
    %41 = vector.load %arg4[%c0_19, %c0_20] : memref<20x128xf32, #tpu.memory_space<vmem>>, vector<20x128xf32>
    %cst_21 = arith.constant dense<0.000000e+00> : vector<128x128xf32>
    %42 = tpu.matmul %40, %41, %cst_21 {dimension_numbers = #tpu.dot_dimension_numbers<[1], [0], [0], [1], [0, 0, 1, 1], [], []>} : vector<128x20xf32>, vector<20x128xf32>, vector<128x128xf32> -> vector<128x128xf32>
    %43 = arith.addf %39, %42 : vector<128x128xf32>
    %c0_22 = arith.constant 0 : index
    %c0_23 = arith.constant 0 : index
    %44 = vector.load %arg11[%c0_22, %c0_23] : memref<128x1xf32, #tpu.memory_space<vmem>>, vector<128x1xf32>
    %45 = vector.broadcast %44 : vector<128x1xf32> to vector<128x128xf32>
    %46 = arith.addf %43, %45 : vector<128x128xf32>
    %c0_24 = arith.constant 0 : index
    %c0_25 = arith.constant 0 : index
    %47 = vector.load %arg5[%c0_24, %c0_25] : memref<20x128xf32, #tpu.memory_space<vmem>>, vector<20x128xf32>
    %48 = vector.extract_strided_slice %46 {offsets = [0, 0], sizes = [20, 128], strides = [1, 1]} : vector<128x128xf32> to vector<20x128xf32>
    %49 = arith.negf %48 : vector<20x128xf32>
    %50 = math.exp %49 : vector<20x128xf32>
    %cst_26 = arith.constant 1.000000e+00 : f32
    %51 = vector.broadcast %cst_26 : f32 to vector<20x128xf32>
    %52 = arith.addf %51, %50 : vector<20x128xf32>
    %53 = arith.divf %51, %52 : vector<20x128xf32>
    %54 = vector.extract_strided_slice %46 {offsets = [32, 0], sizes = [20, 128], strides = [1, 1]} : vector<128x128xf32> to vector<20x128xf32>
    %55 = arith.negf %54 : vector<20x128xf32>
    %56 = math.exp %55 : vector<20x128xf32>
    %cst_27 = arith.constant 1.000000e+00 : f32
    %57 = vector.broadcast %cst_27 : f32 to vector<20x128xf32>
    %58 = arith.addf %57, %56 : vector<20x128xf32>
    %59 = arith.divf %57, %58 : vector<20x128xf32>
    %60 = vector.extract_strided_slice %46 {offsets = [64, 0], sizes = [20, 128], strides = [1, 1]} : vector<128x128xf32> to vector<20x128xf32>
    %61 = math.tanh %60 : vector<20x128xf32>
    %62 = vector.extract_strided_slice %46 {offsets = [96, 0], sizes = [20, 128], strides = [1, 1]} : vector<128x128xf32> to vector<20x128xf32>
    %63 = arith.negf %62 : vector<20x128xf32>
    %64 = math.exp %63 : vector<20x128xf32>
    %cst_28 = arith.constant 1.000000e+00 : f32
    %65 = vector.broadcast %cst_28 : f32 to vector<20x128xf32>
    %66 = arith.addf %65, %64 : vector<20x128xf32>
    %67 = arith.divf %65, %66 : vector<20x128xf32>
    %68 = arith.mulf %59, %47 : vector<20x128xf32>
    %69 = arith.mulf %53, %61 : vector<20x128xf32>
    %70 = arith.addf %68, %69 : vector<20x128xf32>
    %71 = math.tanh %70 : vector<20x128xf32>
    %72 = arith.mulf %67, %71 : vector<20x128xf32>
    %c0_29 = arith.constant 0 : index
    %c0_30 = arith.constant 0 : index
    %73 = vector.load %arg12[%c0_29, %c0_30] : memref<20x1xf32, #tpu.memory_space<vmem>>, vector<20x1xf32>
    %74 = vector.broadcast %73 : vector<20x1xf32> to vector<20x128xf32>
    %75 = arith.mulf %74, %72 : vector<20x128xf32>
    %cst_31 = arith.constant dense<0.000000e+00> : vector<128xf32>
    %76 = vector.multi_reduction <add>, %75, %cst_31 [0] : vector<20x128xf32> to vector<128xf32>
    %77 = vector.shape_cast %76 : vector<128xf32> to vector<1x128xf32>
    %c0_32 = arith.constant 0 : index
    %c0_33 = arith.constant 0 : index
    %78 = vector.load %arg13[%c0_32, %c0_33] : memref<1x1xf32, #tpu.memory_space<vmem>>, vector<1x1xf32>
    %79 = vector.broadcast %78 : vector<1x1xf32> to vector<1x128xf32>
    %80 = arith.addf %77, %79 : vector<1x128xf32>
    %c0_34 = arith.constant 0 : index
    %c0_35 = arith.constant 0 : index
    %81 = vector.load %arg14[%c0_34, %c0_35] : memref<1x128xf32, #tpu.memory_space<vmem>>, vector<1x128xf32>
    tpu.vector_store %arg14[%c0_34, %c0_35], %80 {strides = array<i32>} : memref<1x128xf32, #tpu.memory_space<vmem>>, vector<1x128xf32>,
    %c0_36 = arith.constant 0 : index
    %c0_37 = arith.constant 0 : index
    %82 = vector.load %arg15[%c0_36, %c0_37] : memref<20x128xf32, #tpu.memory_space<vmem>>, vector<20x128xf32>
    tpu.vector_store %arg15[%c0_36, %c0_37], %37 {strides = array<i32>} : memref<20x128xf32, #tpu.memory_space<vmem>>, vector<20x128xf32>,
    %c0_38 = arith.constant 0 : index
    %c0_39 = arith.constant 0 : index
    %83 = vector.load %arg16[%c0_38, %c0_39] : memref<20x128xf32, #tpu.memory_space<vmem>>, vector<20x128xf32>
    tpu.vector_store %arg16[%c0_38, %c0_39], %35 {strides = array<i32>} : memref<20x128xf32, #tpu.memory_space<vmem>>, vector<20x128xf32>,
    %c0_40 = arith.constant 0 : index
    %c0_41 = arith.constant 0 : index
    %84 = vector.load %arg17[%c0_40, %c0_41] : memref<20x128xf32, #tpu.memory_space<vmem>>, vector<20x128xf32>
    tpu.vector_store %arg17[%c0_40, %c0_41], %72 {strides = array<i32>} : memref<20x128xf32, #tpu.memory_space<vmem>>, vector<20x128xf32>,
    %c0_42 = arith.constant 0 : index
    %c0_43 = arith.constant 0 : index
    %85 = vector.load %arg18[%c0_42, %c0_43] : memref<20x128xf32, #tpu.memory_space<vmem>>, vector<20x128xf32>
    tpu.vector_store %arg18[%c0_42, %c0_43], %70 {strides = array<i32>} : memref<20x128xf32, #tpu.memory_space<vmem>>, vector<20x128xf32>,
    return
  }
  func.func @transform_0(%arg0: i32) -> (i32, i32) {
    %c0_i32 = arith.constant 0 : i32
    %c0_i32_0 = arith.constant 0 : i32
    return %c0_i32, %arg0 : i32, i32
  }
  func.func @transform_1(%arg0: i32) -> (i32, i32) {
    %c0_i32 = arith.constant 0 : i32
    %c0_i32_0 = arith.constant 0 : i32
    return %c0_i32, %arg0 : i32, i32
  }
  func.func @transform_2(%arg0: i32) -> (i32, i32) {
    %c0_i32 = arith.constant 0 : i32
    %c0_i32_0 = arith.constant 0 : i32
    return %c0_i32, %arg0 : i32, i32
  }
  func.func @transform_3(%arg0: i32) -> (i32, i32) {
    %c0_i32 = arith.constant 0 : i32
    %c0_i32_0 = arith.constant 0 : i32
    return %c0_i32, %arg0 : i32, i32
  }
  func.func @transform_4(%arg0: i32) -> (i32, i32) {
    %c0_i32 = arith.constant 0 : i32
    %c0_i32_0 = arith.constant 0 : i32
    return %c0_i32, %arg0 : i32, i32
  }
  func.func @transform_5(%arg0: i32) -> (i32, i32) {
    %c0_i32 = arith.constant 0 : i32
    %c0_i32_0 = arith.constant 0 : i32
    %c0_i32_1 = arith.constant 0 : i32
    return %c0_i32, %c0_i32_0 : i32, i32
  }
  func.func @transform_6(%arg0: i32) -> (i32, i32) {
    %c0_i32 = arith.constant 0 : i32
    %c0_i32_0 = arith.constant 0 : i32
    %c0_i32_1 = arith.constant 0 : i32
    return %c0_i32, %c0_i32_0 : i32, i32
  }
  func.func @transform_7(%arg0: i32) -> (i32, i32) {
    %c0_i32 = arith.constant 0 : i32
    %c0_i32_0 = arith.constant 0 : i32
    %c0_i32_1 = arith.constant 0 : i32
    return %c0_i32, %c0_i32_0 : i32, i32
  }
  func.func @transform_8(%arg0: i32) -> (i32, i32) {
    %c0_i32 = arith.constant 0 : i32
    %c0_i32_0 = arith.constant 0 : i32
    %c0_i32_1 = arith.constant 0 : i32
    return %c0_i32, %c0_i32_0 : i32, i32
  }
  func.func @transform_9(%arg0: i32) -> (i32, i32) {
    %c0_i32 = arith.constant 0 : i32
    %c0_i32_0 = arith.constant 0 : i32
    %c0_i32_1 = arith.constant 0 : i32
    return %c0_i32, %c0_i32_0 : i32, i32
  }
  func.func @transform_10(%arg0: i32) -> (i32, i32) {
    %c0_i32 = arith.constant 0 : i32
    %c0_i32_0 = arith.constant 0 : i32
    %c0_i32_1 = arith.constant 0 : i32
    return %c0_i32, %c0_i32_0 : i32, i32
  }
  func.func @transform_11(%arg0: i32) -> (i32, i32) {
    %c0_i32 = arith.constant 0 : i32
    %c0_i32_0 = arith.constant 0 : i32
    %c0_i32_1 = arith.constant 0 : i32
    return %c0_i32, %c0_i32_0 : i32, i32
  }
  func.func @transform_12(%arg0: i32) -> (i32, i32) {
    %c0_i32 = arith.constant 0 : i32
    %c0_i32_0 = arith.constant 0 : i32
    %c0_i32_1 = arith.constant 0 : i32
    return %c0_i32, %c0_i32_0 : i32, i32
  }
  func.func @transform_13(%arg0: i32) -> (i32, i32) {
    %c0_i32 = arith.constant 0 : i32
    %c0_i32_0 = arith.constant 0 : i32
    return %c0_i32, %arg0 : i32, i32
  }
  func.func @transform_14(%arg0: i32) -> (i32, i32) {
    %c0_i32 = arith.constant 0 : i32
    %c0_i32_0 = arith.constant 0 : i32
    return %c0_i32, %arg0 : i32, i32
  }
  func.func @transform_15(%arg0: i32) -> (i32, i32) {
    %c0_i32 = arith.constant 0 : i32
    %c0_i32_0 = arith.constant 0 : i32
    return %c0_i32, %arg0 : i32, i32
  }
  func.func @transform_16(%arg0: i32) -> (i32, i32) {
    %c0_i32 = arith.constant 0 : i32
    %c0_i32_0 = arith.constant 0 : i32
    return %c0_i32, %arg0 : i32, i32
  }
  func.func @transform_17(%arg0: i32) -> (i32, i32) {
    %c0_i32 = arith.constant 0 : i32
    %c0_i32_0 = arith.constant 0 : i32
    return %c0_i32, %arg0 : i32, i32
  }
}

</mosaic_0001>

<bundles_post_ra>
// kernel: tpu_custom_call.1
= control target key start
LH: loop header
LB: loop body
LE: loop exit
PB: predicated region body
PF: predicated region fallthrough
CT: control target
= control target key end

     0   :  { %s4038_s0 = inlined_call_operand.vmem [shape: f32[1,384], index: 0, kind: input, shape index: {}]   ;;  %s4039_s1 = inlined_call_operand.hbm [shape: f32[20,384], index: 1, kind: input, shape index: {}, may-alias: {1,14}]   ;;  %s4040_s2 = inlined_call_operand.hbm [shape: f32[20,384], index: 2, kind: input, shape index: {}, may-alias: {2,15}]   ;;  %s4041_s3 = inlined_call_operand.hbm [shape: f32[20,384], index: 3, kind: input, shape index: {}, may-alias: {3,16}]   ;;  %s4042_s4 = inlined_call_operand.hbm [shape: f32[20,384], index: 4, kind: input, shape index: {}, may-alias: {4,17}]   ;;  %s4043_s5 = inlined_call_operand.vmem [shape: f32[128,1], index: 5, kind: input, shape index: {}]   ;;  %s4044_s6 = inlined_call_operand.vmem [shape: f32[128,20], index: 6, kind: input, shape index: {}]   ;;  %s4045_s7 = inlined_call_operand.vmem [shape: f32[128,1], index: 7, kind: input, shape index: {}]   ;;  %s4046_s8 = inlined_call_operand.vmem [shape: f32[128,20], index: 8, kind: input, shape index: {}]   ;;  %s4047_s9 = inlined_call_operand.vmem [shape: f32[128,20], index: 9, kind: input, shape index: {}]   ;;  %s4048_s10 = inlined_call_operand.vmem [shape: f32[128,1], index: 10, kind: input, shape index: {}]   ;;  %s4049_s11 = inlined_call_operand.vmem [shape: f32[20,1], index: 11, kind: input, shape index: {}]   ;;  %s4050_s12 = inlined_call_operand.<no memory space> [shape: f32[1,1], index: 12, kind: input, shape index: {}]   ;;  %s4051_s13 = inlined_call_operand.hbm [shape: f32[1,384], index: 13, kind: output, shape index: {0}]   ;;  %s4052_s14 = inlined_call_operand.hbm [shape: f32[20,384], index: 14, kind: output, shape index: {1}, may-alias: {1,14}]   ;;  %s4053_s15 = inlined_call_operand.hbm [shape: f32[20,384], index: 15, kind: output, shape index: {2}, may-alias: {2,15}]   ;;  %s4054_s16 = inlined_call_operand.hbm [shape: f32[20,384], index: 16, kind: output, shape index: {3}, may-alias: {3,16}]   ;;  %s4055_s17 = inlined_call_operand.hbm [shape: f32[20,384], index: 17, kind: output, shape index: {4}, may-alias: {4,17}]  }
   0x1   :  { %4085 = sst [smem:[#allocation31_spill]] %s4038_s0  ;;  %v23_v0 = vstv %s4050_s12 }
   0x2   :  { %4086 = sst [smem:[#allocation32_spill]] %s4039_s1  ;;  %24 = vst [vmem:[#allocation2] sm:$0x1] %v23_v0 }
   0x3   :  { %4087 = sst [smem:[#allocation33_spill]] %s4040_s2 }
   0x4   :  { %4088 = sst [smem:[#allocation34_spill]] %s4041_s3 }
   0x5   :  { %4089 = sst [smem:[#allocation35_spill]] %s4042_s4 }
   0x6   :  { %4090 = sst [smem:[#allocation36_spill]] %s4046_s8 }
   0x7   :  { %4091 = sst [smem:[#allocation37_spill]] %s4047_s9 }
   0x8   :  { %4092 = sst [smem:[#allocation38_spill]] %s4049_s11 }
   0x9   :  { %4093 = sst [smem:[#allocation39_spill]] %s4051_s13 }
   0xa   :  { %4094 = sst [smem:[#allocation40_spill]] %s4052_s14 }
   0xb   :  { %4095 = sst [smem:[#allocation41_spill]] %s4053_s15 }
   0xc   :  { %4096 = sst [smem:[#allocation42_spill]] %s4054_s16 }
   0xd   :  { %4097 = sst [smem:[#allocation43_spill]] %s4055_s17 }
   0xe   :  { %25 = vsyncpa [#allocation4], 0 }
   0xf   :  { %27 = vsyncpa [#allocation4 + $0x1], 0 }
  0x10   :  { %28 = vsyncpa [#allocation7], 0 }
  0x11   :  { %30 = vsyncpa [#allocation7 + $0x1], 0 }
  0x12   :  { %31 = vsyncpa [#allocation10], 0 }
  0x13   :  { %33 = vsyncpa [#allocation10 + $0x1], 0 }
  0x14   :  { %34 = vsyncpa [#allocation5], 0 }
  0x15   :  { %36 = vsyncpa [#allocation5 + $0x1], 0 }
  0x16   :  { %37 = vsyncpa [#allocation13], 0 }
  0x17   :  { %39 = vsyncpa [#allocation13 + $0x1], 0 }
  0x18   :  { %40 = vsyncpa [#allocation16], 0 }
  0x19   :  { %42 = vsyncpa [#allocation16 + $0x1], 0  ;;  %s2898_s26 = smov 0   ;;  %s2900_s27 = smov 0  }
  0x1a   :  { %s2902_s28 = smov 0   ;;  %s2904_s12 = smov 0  }
  0x1b LB: > { %4098 = sst [smem:[#allocation24_spill]] %s2784_s26  ;;  %s2919_s29 = sadd.s32 4294967295, %s2796_s12   ;;  %s2796_s12 = sphi %s2904_s12, %s4172_s12   ;;  %s2792_s28 = sphi %s2902_s28, %s4177_s28   ;;  %s2788_s27 = sphi %s2900_s27, %s4176_s27   ;;  %s2784_s26 = sphi %s2898_s26, %s4175_s26  }
  0x1c   : > { %4099 = sst [smem:[#allocation25_spill]] %s2792_s28  ;;  %s4058_s0 = sadd.s32 4294967294, %s2796_s12  }
  0x1d   : > { %4100 = sst [smem:[#allocation26_spill]] %s2796_s12  ;;  %s2923_s30 = sadd.s32 1, %s2796_s12  }
  0x1e   : > { %4101 = sst [smem:[#allocation27_spill]] %s2923_s30  ;;  %s81_s18 = sadd.s32 1, %s2792_s28 }
  0x1f   : > { %s78_s19 = ssub.s32 %s2796_s12, %s2923_s30  ;;  %p88_p0 = scmp.ne.s32.totalorder %s2792_s28, %s2788_s27 }
  0x20   : > { %p79_p1 = scmp.eq.s32.totalorder %s78_s19, 0  ;;  %p89_p2 = scmp.eq.s32.totalorder %s2796_s12, 0 }
  0x21   : > { %p94_p3 = scmp.ne.s32.totalorder %s2788_s27, %s2784_s26  ;;  %p95_p4 = scmp.eq.s32.totalorder %s2919_s29, 0 }
  0x22   : > { %s2935_s1 = scalar_select %p79_p1, %s2792_s28, %s81_s18  }
  0x23   : > { %p90_p5 = por %p89_p2, %p88_p0  ;;  %p2937_p6 = por %p95_p4, %p94_p3 }
  0x24   : > { %4102 = sst [smem:[#allocation28_spill]] %s2935_s1  ;;  %p364_p7 = scmp.eq.s32.totalorder %s2919_s29, 2 }
  0x25   : > { %p370_p8 = scmp.eq.s32.totalorder %s4058_s0, 2  ;;  %p2341_p9 = scmp.lt.s32.totalorder %s2796_s12, 3 }
  0x26   : > { %p2945_p10 = por %p364_p7, %p88_p0  ;;  %s2954_s23 = sand.u32 1, %s2792_s28  }
  0x27   : > { %p2949_p11 = por %p370_p8, %p94_p3  ;;  %s2957_s24 = sshll.u32 %s2796_s12, 3 }
  0x28   : > { %s4104_s21 = scalar_select %p2945_p10, 1, 0 }
  0x29   : > { %s4106_s22 = scalar_select %p2949_p11, 1, 0 }
  0x2a   : > { %4105 = sst [smem:[#allocation29_spill]] %s4104_s21  ;;  %s2960_s25 = smul.u32 24, %s2954_s23 }
  0x2b   : > { %4107 = sst [smem:[#allocation30_spill]] %s4106_s22  ;;  %p2962_p12 = pnand %p2341_p9, %p90_p5 }
  0x2c   : > { %s545_s19 = sand.u32 1, %s2796_s12   ;;  %s4109_s2 = sld [smem:[#allocation33_spill]] }
  0x2d   : > { %s549_s22 = scalar_lea.vmem [#allocation6], %s2960_s25  ;;  %s2972_s13 = scalar_lea.sflag [#allocation7], %s545_s19 }
  0x2e   : > { %s556_s26 = sshll.u32 %s549_s22, 4  ;;  %p2486_p0 = pneg %p2962_p12  ;;  %s557_s26 = int_to_ptr.vmem [resolvable:$true] %s556_s26 }
  0x32   : > { %s553_s30 = scalar_lea.hbm %s4109_s2, %s2957_s24 }
  0x33   : > { %s554_s28 = sshll.u32 %s553_s30, 4  ;;  %s2489_s30 = scalar_lea.hbm %s4109_s2, 72  ;;  %s555_s28 = int_to_ptr.hbm [resolvable:$true] %s554_s28 }
  0x34   : > { %s2482_s17 = sshra.s32 %s555_s28, 4  ;;  %s2483_s17 = int_to_ptr.hbm [resolvable:$true] %s2482_s17 }
  0x35   : > { %s2484_s16 = scalar_lea.hbm %s2483_s17, 24  ;;  %p2490_p3 = scmp.lt.s32.totalorder %s2483_s17, %s4109_s2 }
  0x36   : > { %p2485_p13 = scmp.ne.s32.totalorder %s2483_s17, %s2484_s16  ;;  %p2491_p4 = scmp.lt.s32.totalorder %s2489_s30, %s2484_s16 }
  0x38   : > { %p2487_p1 = pnand %p2486_p0, %p2485_p13  ;;  %p2492_p5 = por %p2491_p4, %p2490_p3 }
  0x3a   : > { %p2488_p2 = pneg %p2487_p1 }
  0x3c   : > { %p2493_p7 = pnand %p2492_p5, %p2488_p2 }
  0x3e   : > { %2496 = shalt.err (!%p2493_p7)
}
  0x3f   : > { %s4074_s19 = smov 384   ;;  %s2799_s14 = smov 128  }
  0x40   : > { %s2800_s21 = smov 8   ;;  %p2204_p8 = scmp.ge.s32.totalorder %s2796_s12, 1 }
  0x41   : > { %2318 = dma.hbm_to_vmem [thread:$0]  (!%p2962_p12), %s555_s28, 384, %s557_s26, %s2972_s13, %s4074_s19, %s2799_s14, %s2800_s21  }
  0x42   : > { %p606_p9 = scmp.lt.s32.totalorder %s2796_s12, 4  ;;  %s4111_s0 = sld [smem:[#allocation32_spill]] }
  0x43   : > { %s528_s22 = scalar_lea.vmem [#allocation3], %s2960_s25  ;;  %s525_s8 = scalar_lea.sflag [#allocation4], %s2954_s23 }
  0x44   : > { %p2993_p13 = pnand %p2204_p8, %p606_p9  ;;  %s535_s2 = sshll.u32 %s528_s22, 4  ;;  %s536_s2 = int_to_ptr.vmem [resolvable:$true] %s535_s2 }
  0x48   : > { %s532_s30 = scalar_lea.hbm %s4111_s0, %s2957_s24  ;;  %s2519_s19 = scalar_lea.hbm %s4111_s0, 72 }
  0x49   : > { %s533_s1 = sshll.u32 %s532_s30, 4  ;;  %s534_s1 = int_to_ptr.hbm [resolvable:$true] %s533_s1 }
  0x4a   : > { %s2512_s9 = sshra.s32 %s534_s1, 4  ;;  %s2513_s9 = int_to_ptr.hbm [resolvable:$true] %s2512_s9 }
  0x4b   : > { %s2514_s11 = scalar_lea.hbm %s2513_s9, 24  ;;  %p2520_p4 = scmp.lt.s32.totalorder %s2513_s9, %s4111_s0 }
  0x4c   : > { %p2515_p1 = scmp.ne.s32.totalorder %s2513_s9, %s2514_s11  ;;  %p2521_p5 = scmp.lt.s32.totalorder %s2519_s19, %s2514_s11 }
  0x4e   : > { %p2517_p2 = pnand %p2515_p1, %p2486_p0  ;;  %p2522_p7 = por %p2521_p5, %p2520_p4 }
  0x50   : > { %p2518_p3 = pneg %p2517_p2 }
  0x52   : > { %p2523_p8 = pnand %p2522_p7, %p2518_p3 }
  0x54   : > { %2526 = shalt.err (!%p2523_p8)
}
  0x55   : > { %s4112_s30 = smov 384   ;;  %s4113_s3 = sld [smem:[#allocation34_spill]] }
  0x56   : > { %2315 = dma.hbm_to_vmem [thread:$0]  (!%p2962_p12), %s534_s1, 384, %s536_s2, %s525_s8, %s4112_s30, %s2799_s14, %s2800_s21  }
  0x57   : > { %s570_s16 = scalar_lea.vmem [#allocation8], %s2960_s25 }
  0x58   : > { %s577_s9 = sshll.u32 %s570_s16, 4  ;;  %s578_s9 = int_to_ptr.vmem [resolvable:$true] %s577_s9 }
  0x5b   : > { %s574_s28 = scalar_lea.hbm %s4113_s3, %s2957_s24  ;;  %s2549_s2 = scalar_lea.hbm %s4113_s3, 72 }
  0x5c   : > { %s575_s12 = sshll.u32 %s574_s28, 4  ;;  %s576_s12 = int_to_ptr.hbm [resolvable:$true] %s575_s12 }
  0x5d   : > { %s2542_s11 = sshra.s32 %s576_s12, 4  ;;  %s2543_s11 = int_to_ptr.hbm [resolvable:$true] %s2542_s11 }
  0x5e   : > { %s2544_s19 = scalar_lea.hbm %s2543_s11, 24  ;;  %p2550_p3 = scmp.lt.s32.totalorder %s2543_s11, %s4113_s3 }
  0x5f   : > { %p2545_p9 = scmp.ne.s32.totalorder %s2543_s11, %s2544_s19  ;;  %p2551_p4 = scmp.lt.s32.totalorder %s2549_s2, %s2544_s19 }
  0x61   : > { %p2547_p1 = pnand %p2545_p9, %p2486_p0  ;;  %p2552_p5 = por %p2551_p4, %p2550_p3 }
  0x63   : > { %p2548_p2 = pneg %p2547_p1 }
  0x65   : > { %p2553_p7 = pnand %p2552_p5, %p2548_p2 }
  0x67   : > { %2556 = shalt.err (!%p2553_p7)
}
  0x68   : > { %2321 = dma.hbm_to_vmem [thread:$0]  (!%p2962_p12), %s576_s12, 384, %s578_s9, %s2972_s13, %s4112_s30, %s2799_s14, %s2800_s21  }
  0x69   : > { %s4114_s4 = sld [smem:[#allocation35_spill]]  ;;  %s591_s28 = scalar_lea.vmem [#allocation9], %s2960_s25 }
  0x6a   : > { %s598_s16 = sshll.u32 %s591_s28, 4  ;;  %s588_s19 = scalar_lea.sflag [#allocation10], %s2954_s23  ;;  %s599_s16 = int_to_ptr.vmem [resolvable:$true] %s598_s16 }
  0x6f   : > { %s595_s26 = scalar_lea.hbm %s4114_s4, %s2957_s24  ;;  %s2579_s12 = scalar_lea.hbm %s4114_s4, 72 }
  0x70   : > { %s596_s11 = sshll.u32 %s595_s26, 4  ;;  %s597_s11 = int_to_ptr.hbm [resolvable:$true] %s596_s11 }
  0x71   : > { %s2572_s17 = sshra.s32 %s597_s11, 4  ;;  %s2573_s17 = int_to_ptr.hbm [resolvable:$true] %s2572_s17 }
  0x72   : > { %s2574_s2 = scalar_lea.hbm %s2573_s17, 24  ;;  %p2580_p2 = scmp.lt.s32.totalorder %s2573_s17, %s4114_s4 }
  0x73   : > { %p2575_p8 = scmp.ne.s32.totalorder %s2573_s17, %s2574_s2  ;;  %p2581_p3 = scmp.lt.s32.totalorder %s2579_s12, %s2574_s2 }
  0x75   : > { %p2577_p9 = pnand %p2575_p8, %p2486_p0  ;;  %p2582_p4 = por %p2581_p3, %p2580_p2 }
  0x77   : > { %p2578_p1 = pneg %p2577_p9 }
  0x79   : > { %p2583_p5 = pnand %p2582_p4, %p2578_p1 }
  0x7b   : > { %2586 = shalt.err (!%p2583_p5)
}
  0x7c   : > { %2324 = dma.hbm_to_vmem [thread:$0]  (!%p2962_p12), %s597_s11, 384, %s599_s16, %s588_s19, %s4112_s30, %s2799_s14, %s2800_s21  }
  0x7d   : > { %610 = sbr.rel (%p2993_p13) target bundleno = 651 (0x28b), region = 72  ;;  %s3060_s23 = sand.u32 (!%p2993_p13), 1, %s2788_s27  }
  0x7e   : > { %s3063_s25 = smul.u32 (!%p2993_p13), 24, %s3060_s23  ;;  %s613_s1 = scalar_lea.sflag (!%p2993_p13), [#allocation4], %s3060_s23 }
  0x80   : > { %s616_s0 = scalar_lea.vmem (!%p2993_p13), [#allocation3], %s3063_s25 }
  0x82   : > { %2759 = dma.done.wait (%p2937_p6), %s613_s1, 384  }
  0x83   : > { %2761 = vsyncadd (%p2937_p6), %s613_s1, 4294966912  ;;  %s3072_s14 = sand.u32 1, %s2919_s29   ;;  %s3076_s18 = scalar_lea.vmem [#allocation6], %s3063_s25 }
  0x84   : > { %s623_s21 = scalar_lea.sflag [#allocation7], %s3072_s14 }
  0x85   : > { %2763 = dma.done.wait (%p2937_p6), %s623_s21, 768  }
  0x86   : > { %2765 = vsyncadd (%p2937_p6), %s623_s21, 4294966528  ;;  %s3083_s15 = scalar_lea.vmem [#allocation8], %s3063_s25  ;;  %s643_s30 = scalar_lea.sflag [#allocation10], %s3060_s23 }
  0x87   : > { %s3087_s22 = scalar_lea.vmem [#allocation9], %s3063_s25 }
  0x88   : > { %2767 = dma.done.wait (%p2937_p6), %s643_s30, 384  }
  0x89   : > { %2769 = vsyncadd (%p2937_p6), %s643_s30, 4294966912  ;;  %v2801_v1 = vmov 0   ;;  %vm894_vm0 = vcmask 1043456   ;;  %v844_v2 = vld [vmem:[%s616_s0 + $0x10] sm:$0xf]  ;;  %p735_p12 = scmp.lt.s32.totalorder %s2919_s29, 2 }
  0x8a   : > { %2384 = vset.pattern.permute.xlu2 %v2801_v1  ;;  %2383 = vset.pattern.permute.xlu1 %v2801_v1  ;;  %v741_v3 = vld [vmem:[%s4043_s5 + $0x10] sm:$0xff]  ;;  %v740_v4 = vld [vmem:[%s4043_s5 + $0x8] sm:$0xff]  ;;  %v739_v5 = vld [vmem:[%s4043_s5] sm:$0xff]  ;;  %vm845_vm1 = vcmask 162816   ;;  %s4115_s16 = sld [smem:[#allocation31_spill]]  ;;  %s3487_s9 = scalar_lea.vmem [#allocation14], %s3063_s25 }
  0x8b   : > { %2382 = vset.pattern.permute.xlu0 %v2801_v1  ;;  %2205 = vmatpush.msk.msra.mxu0 %vm894_vm0, %v844_v2  ;;  %v843_v6 = vld [vmem:[%s616_s0 + $0x8] sm:$0xff]  ;;  %v842_v7 = vld [vmem:[%s616_s0] sm:$0xff]  ;;  %s3114_s12 = scalar_select %p735_p12, %s2919_s29, 2 }
  0x8c   : > { %2280 = vmatpush.msk.msra.mxu3 %vm894_vm0, %v844_v2  ;;  %763 = vperm.xlu0 %2382, %v741_v3   ;;  %v826_v8 = vld [vmem:[%s4044_s6] sm:$0xff]  ;;  %v744_v10 = vld [vmem:[%s4043_s5 + $0x30] sm:$0xff]  ;;  %v743_v11 = vld [vmem:[%s4043_s5 + $0x28] sm:$0xff]  ;;  %s4116_s17 = sld [smem:[#allocation38_spill]]  ;;  %s3679_s26 = sshll.u32 %s2919_s29, 3 }
  0x8d   : > { %758 = vperm.xlu1 %2383, %v740_v4   ;;  %753 = vperm.xlu2 %2384, %v739_v5   ;;  %v838_v9 = vld [vmem:[%s4044_s6 + $0x60] sm:$0xff]  ;;  %v827_v13 = vld [vmem:[%s4044_s6 + $0x8] sm:$0xff]  ;;  %v973_v15 = vld [vmem:[%s4045_s7 + $0x10] sm:$0xff]  ;;  %s4117_s30 = sld [smem:[#allocation37_spill]]  ;;  %s4080_s24 = scalar_lea.sflag [#allocation13], %s3072_s14 }
  0x8e   : > { %912 = vmatpush.msra.mxu0 %v843_v6  ;;  %2281 = vmatpush.msra.mxu3 %v843_v6  ;;  %v742_v12 = vld [vmem:[%s4043_s5 + $0x20] sm:$0xff]  ;;  %v839_v14 = vld [vmem:[%s4044_s6 + $0x68] sm:$0xff]  ;;  %v976_v16 = vld [vmem:[%s4045_s7 + $0x30] sm:$0xff]  ;;  %s4138_s28 = sld [smem:[#allocation36_spill]] }
  0x8f   : > { %v972_v17 = vld [vmem:[%s4045_s7 + $0x8] sm:$0xff]  ;;  %v828_v18 = vld [vmem:[%s4044_s6 + $0x10] sm:$0xff]  ;;  %v971_v21 = vld [vmem:[%s4045_s7] sm:$0xff]  ;;  %s4141_s2 = sld [smem:[#allocation40_spill]] }
  0x90   : > { %913 = vmatpush.msra.mxu0 %v842_v7  ;;  %2282 = vmatpush.msra.mxu3 %v842_v7  ;;  %s737_s11 = scalar_lea.vmem %s4115_s16, %s3114_s12  ;;  %v840_v19 = vld [vmem:[%s4044_s6 + $0x70] sm:$0xff]  ;;  %v975_v20 = vld [vmem:[%s4045_s7 + $0x28] sm:$0xff]  ;;  %v974_v22 = vld [vmem:[%s4045_s7 + $0x20] sm:$0xff]  ;;  %s3545_s12 = scalar_lea.vmem [#allocation12], %s3063_s25 }
  0x91   : > { %2206 = vmatmul.msk.f32.vlgmr.msra.gmra.mxu0 %vm845_vm1, %v826_v8  ;;  %2218 = vmatmul.msk.f32.vlgmr.msra.gmra.mxu3 %vm845_vm1, %v838_v9  ;;  %v829_v23 = vld [vmem:[%s4044_s6 + $0x18] sm:$0xff]  ;;  %v750_v24 = vld [vmem:[%s4043_s5 + $0x70] sm:$0xff]  ;;  %v749_v25 = vld [vmem:[%s4043_s5 + $0x68] sm:$0xff] }
  0x92   : > { %v748_v26 = vld [vmem:[%s4043_s5 + $0x60] sm:$0xff]  ;;  %v982_v28 = vld [vmem:[%s4045_s7 + $0x70] sm:$0xff]  ;;  %v981_v29 = vld [vmem:[%s4045_s7 + $0x68] sm:$0xff] }
  0x93   : > { %v830_v27 = vld [vmem:[%s4044_s6 + $0x20] sm:$0xff]  ;;  %v831_v31 = vld [vmem:[%s4044_s6 + $0x28] sm:$0xff]  ;;  %v747_v32 = vld [vmem:[%s4043_s5 + $0x50] sm:$0xff] }
  0x94   : > { %778 = vperm.xlu0 %2382, %v744_v10   ;;  %v980_v30 = vld [vmem:[%s4045_s7 + $0x60] sm:$0xff]  ;;  %v746_v33 = vld [vmem:[%s4043_s5 + $0x48] sm:$0xff]  ;;  %v832_v35 = vld [vmem:[%s4044_s6 + $0x30] sm:$0xff]  ;;  %s4139_s20 = smov %s4138_s28 }
  0x95   : > { %773 = vperm.xlu1 %2383, %v743_v11   ;;  %768 = vperm.xlu2 %2384, %v742_v12   ;;  %v745_v34 = vld [vmem:[%s4043_s5 + $0x40] sm:$0xff]  ;;  %v979_v36 = vld [vmem:[%s4045_s7 + $0x50] sm:$0xff]  ;;  %v978_v37 = vld [vmem:[%s4045_s7 + $0x48] sm:$0xff]  ;;  %s1876_s8 = scalar_lea.hbm %s4141_s2, %s3679_s26  ;;  %s2622_s0 = scalar_lea.hbm %s4141_s2, 72 }
  0x96   : > { %v977_v38 = vld [vmem:[%s4045_s7 + $0x40] sm:$0xff]  ;;  %v833_v39 = vld [vmem:[%s4044_s6 + $0x38] sm:$0xff]  ;;  %v1507_v41 = vld [vmem:[%s4048_s10 + $0x8] sm:$0xff]  ;;  %s1879_s13 = sshll.u32 %s1876_s8, 4  ;;  %s1880_s13 = int_to_ptr.hbm [resolvable:$true] %s1879_s13 }
  0x97   : > { %v1506_v40 = vld [vmem:[%s4048_s10] sm:$0xff]  ;;  %v1510_v44 = vld [vmem:[%s4048_s10 + $0x28] sm:$0xff]  ;;  %v1508_v45 = vld [vmem:[%s4048_s10 + $0x10] sm:$0xff]  ;;  %s2616_s1 = sshra.s32 %s1880_s13, 4  ;;  %s2617_s1 = int_to_ptr.hbm [resolvable:$true] %s2616_s1 }
  0x98   : > { %v1509_v42 = vld [vmem:[%s4048_s10 + $0x20] sm:$0xff]  ;;  %v1511_v46 = vld [vmem:[%s4048_s10 + $0x30] sm:$0xff]  ;;  %v835_v47 = vld [vmem:[%s4044_s6 + $0x48] sm:$0xff]  ;;  %p2623_p7 = scmp.lt.s32.totalorder %s2617_s1, %s4141_s2 }
  0x99   : > { %2207 = vmatmul.msk.f32.gmra.mxu0 %vm845_vm1, %v827_v13  ;;  %2219 = vmatmul.msk.f32.gmra.mxu3 %vm845_vm1, %v839_v14  ;;  %v834_v43 = vld [vmem:[%s4044_s6 + $0x40] sm:$0xff]  ;;  %v1516_v49 = vld [vmem:[%s4048_s10 + $0x68] sm:$0xff]  ;;  %v1517_v50 = vld [vmem:[%s4048_s10 + $0x70] sm:$0xff] }
  0x9a   : > { %v1515_v48 = vld [vmem:[%s4048_s10 + $0x60] sm:$0xff]  ;;  %v836_v51 = vld [vmem:[%s4044_s6 + $0x50] sm:$0xff]  ;;  %v1513_v53 = vld [vmem:[%s4048_s10 + $0x48] sm:$0xff] }
  0x9b   : > { %v1512_v52 = vld [vmem:[%s4048_s10 + $0x40] sm:$0xff]  ;;  %v1514_v54 = vld [vmem:[%s4048_s10 + $0x50] sm:$0xff]  ;;  %v1783_v56 = vld [vmem:[%s4116_s17 + $0x8] sm:$0xff] }
  0x9c   : > { %995 = vperm.xlu0 %2382, %v973_v15   ;;  %v1782_v55 = vld [vmem:[%s4116_s17] sm:$0xff]  ;;  %v1784_v57 = vld [vmem:[%s4116_s17 + $0x10] sm:$0xf] }
  0x9d   : > { %1010 = vperm.xlu1 %2383, %v976_v16   ;;  %990 = vperm.xlu2 %2384, %v972_v17   ;;  %v1812_v58 = vld [vmem:[#allocation2] sm:$0x1] }
  0x9e   : > { %v3287_v6 = vld [vmem:[%s737_s11] ss:$0 sm:$0xff] }
  0xa1   : > { %2208 = vmatmul.msk.f32.gmra.mxu0 %vm845_vm1, %v828_v18  ;;  %2220 = vmatmul.msk.f32.gmra.mxu3 %vm845_vm1, %v840_v19 }
  0xa4   : > { %1005 = vperm.xlu0 %2382, %v975_v20  }
  0xa5   : > { %985 = vperm.xlu1 %2383, %v971_v21   ;;  %1000 = vperm.xlu2 %2384, %v974_v22  }
  0xa9   : > { %2209 = vmatmul.msk.f32.gmra.mxu0 %vm845_vm1, %v829_v23 }
  0xac   : > { %808 = vperm.xlu0 %2382, %v750_v24  }
  0xad   : > { %803 = vperm.xlu1 %2383, %v749_v25   ;;  %798 = vperm.xlu2 %2384, %v748_v26  }
  0xb1   : > { %2210 = vmatmul.msk.f32.gmra.mxu0 %vm845_vm1, %v830_v27 }
  0xb4   : > { %1040 = vperm.xlu0 %2382, %v982_v28  }
  0xb5   : > { %1035 = vperm.xlu1 %2383, %v981_v29   ;;  %1030 = vperm.xlu2 %2384, %v980_v30  }
  0xb9   : > { %2211 = vmatmul.msk.f32.gmra.mxu0 %vm845_vm1, %v831_v31 }
  0xbc   : > { %793 = vperm.xlu0 %2382, %v747_v32  }
  0xbd   : > { %788 = vperm.xlu1 %2383, %v746_v33   ;;  %783 = vperm.xlu2 %2384, %v745_v34  }
  0xc1   : > { %2212 = vmatmul.msk.f32.gmra.mxu0 %vm845_vm1, %v832_v35 }
  0xc4   : > { %1025 = vperm.xlu0 %2382, %v979_v36  }
  0xc5   : > { %1020 = vperm.xlu1 %2383, %v978_v37   ;;  %1015 = vperm.xlu2 %2384, %v977_v38  }
  0xc9   : > { %2213 = vmatmul.msk.f32.gmra.mxu0 %vm845_vm1, %v833_v39 }
  0xcc   : > { %1520 = vperm.xlu0 %2382, %v1506_v40  }
  0xcd   : > { %1525 = vperm.xlu1 %2383, %v1507_v41   ;;  %1535 = vperm.xlu2 %2384, %v1509_v42   ;;  %v841_v41 = vld [vmem:[%s4044_s6 + $0x78] sm:$0xff] }
  0xce   : > { %2221 = vmatmul.msk.f32.gmra.mxu3 %vm845_vm1, %v841_v41  ;;  %v1277_v41 = vld [vmem:[%s4117_s30 + $0x70] sm:$0xff] }
  0xd1   : > { %2214 = vmatmul.msk.f32.gmra.mxu0 %vm845_vm1, %v834_v43 }
  0xd4   : > { %1540 = vperm.xlu0 %2382, %v1510_v44  }
  0xd5   : > { %1530 = vperm.xlu1 %2383, %v1508_v45   ;;  %1545 = vperm.xlu2 %2384, %v1511_v46  }
  0xd9   : > { %2215 = vmatmul.msk.f32.gmra.mxu0 %vm845_vm1, %v835_v47 }
  0xdc   : > { %1565 = vperm.xlu0 %2382, %v1515_v48   ;;  %v1281_v48 = vld [vmem:[%s3083_s15 + $0x10] sm:$0xf] }
  0xdd   : > { %1570 = vperm.xlu1 %2383, %v1516_v49   ;;  %1575 = vperm.xlu2 %2384, %v1517_v50  }
  0xde   : > { %2283 = vmatpush.msk.msrb.mxu3 %vm894_vm0, %v1281_v48  ;;  %2231 = vmatpush.msk.msra.mxu1 %vm894_vm0, %v1281_v48 }
  0xe1   : > { %2216 = vmatmul.msk.f32.gmra.mxu0 %vm845_vm1, %v836_v51 }
  0xe4   : > { %1550 = vperm.xlu0 %2382, %v1512_v52  }
  0xe5   : > { %1555 = vperm.xlu1 %2383, %v1513_v53   ;;  %1560 = vperm.xlu2 %2384, %v1514_v54  }
  0xe7   : > { %v754_v59 = vpop.permute.xlu2 %753 }
  0xe8   : > { %v814_v8 = vmul.f32 %v3287_v6, %v754_v59  ;;  %v1279_v59 = vld [vmem:[%s3083_s15] sm:$0xff] }
  0xec   : > { %1787 = vperm.xlu0 %2382, %v1782_v55   ;;  %v1280_v55 = vld [vmem:[%s3083_s15 + $0x8] sm:$0xff]  ;;  %s1877_s15 = sshll.u32 %s3545_s12, 4  ;;  %s1878_s15 = int_to_ptr.vmem [resolvable:$true] %s1877_s15 }
  0xed   : > { %1792 = vperm.xlu1 %2383, %v1783_v56   ;;  %1797 = vperm.xlu2 %2384, %v1784_v57  }
  0xee   : > { %2284 = vmatpush.msrb.mxu3 %v1280_v55  ;;  %1347 = vmatpush.msra.mxu1 %v1280_v55 }
  0xef   : > { %v769_v60 = vpop.permute.xlu2 %768 }
  0xf0   : > { %v817_v20 = vmul.f32 %v3287_v6, %v769_v60  ;;  %2285 = vmatpush.msrb.mxu3 %v1279_v59  ;;  %1348 = vmatpush.msra.mxu1 %v1279_v59 }
  0xf4   : > { %1815 = vperm.xlu0 %2382, %v1812_v58  }
  0xf7   : > { %v991_v0 = vpop.permute.xlu2 %990 }
  0xfe   : > { %v764_v62 = vpop.permute.xlu0 %763 }
  0xff   : > { %v759_v61 = vpop.permute.xlu1 %758  ;;  %v1001_v4 = vpop.permute.xlu2 %1000  ;;  %v816_v28 = vmul.f32 %v3287_v6, %v764_v62 }
 0x100   : > { %v815_v12 = vmul.f32 %v3287_v6, %v759_v61 }
 0x106   : > { %v3278_v3 = vpop.permute.xlu0 %778 }
 0x107   : > { %v774_v1 = vpop.permute.xlu1 %773  ;;  %v799_v10 = vpop.permute.xlu2 %798  ;;  %v819_v58 = vmul.f32 %v3287_v6, %v3278_v3 }
 0x108   : > { %v823_v14 = vmul.f32 %v3287_v6, %v799_v10  ;;  %v818_v38 = vmul.f32 %v3287_v6, %v774_v1 }
 0x10e   : > { %v915_v63 = vpop.f32.mrf.mxu0  ;;  %v996_v9 = vpop.permute.xlu0 %995 }
 0x10f   : > { %v3280_v5 = vpop.permute.xlu1 %1010  ;;  %v959_v13 = vadd.f32 %v915_v63, %v814_v8  ;;  %v1031_v23 = vpop.permute.xlu2 %1030 }
 0x114   : > { %v948_v16 = vpop.f32.mrf.mxu3 }
 0x115   : > { %v968_v19 = vadd.f32 %v948_v16, %v823_v14 }
 0x116   : > { %v918_v2 = vpop.f32.mrf.mxu0  ;;  %v1006_v21 = vpop.permute.xlu0 %1005 }
 0x117   : > { %v986_v11 = vpop.permute.xlu1 %985  ;;  %v960_v18 = vadd.f32 %v918_v2, %v815_v12  ;;  %v1052_v25 = vadd.f32 %v1031_v23, %v968_v19  ;;  %v1276_v19 = vld [vmem:[%s4117_s30 + $0x68] sm:$0xff] }
 0x118   : > { %v1043_v17 = vadd.f32 %v986_v11, %v959_v13 }
 0x119   : > { %v1044_v24 = vadd.f32 %v991_v0, %v960_v18  ;;  %v2228_v33 = vmul.f32 -1.442695, %v1052_v25  ;;  %v1275_v0 = vld [vmem:[%s4117_s30 + $0x60] sm:$0xff] }
 0x11a   : > { %v2222_v22 = vmul.f32 -1.442695, %v1043_v17  ;;  %2244 = vmatmul.msk.f32.vlgmr.msrb.gmra.mxu3 %vm845_vm1, %v1275_v0 }
 0x11b   : > { %v2223_v30 = vmul.f32 -1.442695, %v1044_v24 }
 0x11c   : > { %2386 = vpow2.f32 %v2222_v22  ;;  %v951_v31 = vpop.f32.mrf.mxu3 }
 0x11d   : > { %2388 = vpow2.f32 %v2223_v30 }
 0x11e   : > { %v921_v7 = vpop.f32.mrf.mxu0  ;;  %v809_v39 = vpop.permute.xlu0 %808  ;;  %2390 = vpow2.f32 %v2228_v33 }
 0x11f   : > { %v804_v26 = vpop.permute.xlu1 %803  ;;  %v961_v34 = vadd.f32 %v921_v7, %v816_v28  ;;  %v825_v49 = vmul.f32 %v3287_v6, %v809_v39 }
 0x120   : > { %v824_v35 = vmul.f32 %v3287_v6, %v804_v26 }
 0x121   : > { %v1045_v42 = vadd.f32 %v996_v9, %v961_v34 }
 0x122   : > { %v2387_v37 = vpop.eup %2386  ;;  %v969_v43 = vadd.f32 %v951_v31, %v824_v35  ;;  %2245 = vmatmul.msk.f32.gmra.mxu3 %vm845_vm1, %v1276_v19 }
 0x123   : > { %v3300_v45 = vadd.f32 1.0, %v2387_v37  ;;  %v2389_v50 = vpop.eup %2388  ;;  %v2224_v51 = vmul.f32 -1.442695, %v1045_v42 }
 0x124   : > { %v954_v52 = vpop.f32.mrf.mxu3  ;;  %v2391_v56 = vpop.eup %2390  ;;  %v3311_v60 = vadd.f32 1.0, %v2389_v50 }
 0x125   : > { %v970_v61 = vadd.f32 %v954_v52, %v825_v49  ;;  %v3319_v3 = vadd.f32 1.0, %v2391_v56  ;;  %v1079_v28 = vand.u32 2147483647, %v3300_v45  ;;  %v1081_v37 = vand.u32 2147483648, %v3300_v45 }
 0x126   : > { %v924_v15 = vpop.f32.mrf.mxu0  ;;  %v1041_v1 = vpop.permute.xlu0 %1040  ;;  %vm1075_vm2 = vweird.f32 %v3300_v45  ;;  %vm1090_vm6 = vweird.f32 %v3311_v60 }
 0x127   : > { %v1036_v46 = vpop.permute.xlu1 %1035  ;;  %v1054_v9 = vadd.f32 %v1041_v1, %v970_v61  ;;  %vm3371_vm3 = vcmp.eq.f32.partialorder %v1079_v28, 8.507059e+37  ;;  %v1082_v55 = vor.u32 1.1754944e-38, %v1081_v37  ;;  %vm1192_vm8 = vweird.f32 %v3319_v3 }
 0x128   : > { %v1053_v53 = vadd.f32 %v1036_v46, %v969_v43 }
 0x129   : > { %v2230_v16 = vmul.f32 -1.442695, %v1054_v9 }
 0x12a   : > { %v2229_v2 = vmul.f32 -1.442695, %v1053_v53  ;;  %2246 = vmatmul.msk.f32.gmra.mxu3 %vm845_vm1, %v1277_v41 }
 0x12e   : > { %v926_v27 = vpop.f32.mrf.mxu0 }
 0x12f   : > { %v962_v29 = vadd.f32 %v926_v27, %v817_v20 }
 0x131   : > { %v1046_v32 = vadd.f32 %v1001_v4, %v962_v29 }
 0x133   : > { %v2225_v36 = vmul.f32 -1.442695, %v1046_v32 }
 0x135   : > { %2392 = vpow2.f32 %v2225_v36  ;;  %v1196_v36 = vand.u32 2147483647, %v3319_v3 }
 0x136   : > { %v929_v40 = vpop.f32.mrf.mxu0  ;;  %2394 = vrcp.f32 %v3300_v45 }
 0x137   : > { %v963_v44 = vadd.f32 %v929_v40, %v818_v38  ;;  %v789_v38 = vpop.permute.xlu1 %788  ;;  %v1094_v40 = vand.u32 2147483647, %v3311_v60 }
 0x139   : > { %v1047_v47 = vadd.f32 %v1006_v21, %v963_v44 }
 0x13b   : > { %v2226_v54 = vmul.f32 -1.442695, %v1047_v47  ;;  %v2393_v57 = vpop.eup %2392 }
 0x13c   : > { %v3313_v62 = vadd.f32 1.0, %v2393_v57  ;;  %v3323_v8 = vpop.eup %2394 }
 0x13d   : > { %2396 = vpow2.f32 %v2226_v54  ;;  %v1071_v14 = vmul.f32 %v3323_v8, %v3300_v45  ;;  %vm1076_vm5 = vweird.f32 %v3323_v8 }
 0x13e   : > { %v932_v63 = vpop.f32.mrf.mxu0  ;;  %2398 = vpow2.f32 %v2224_v51  ;;  %v1138_v51 = vand.u32 2147483648, %v3313_v62  ;;  %vm1132_vm7 = vweird.f32 %v3313_v62  ;;  %v1136_v56 = vand.u32 2147483647, %v3313_v62  ;;  %vm3406_vm10 = vmor %vm1075_vm2, %vm1076_vm5 }
 0x13f   : > { %v964_v4 = vadd.f32 %v932_v63, %v819_v58  ;;  %2400 = vrcp.f32 %v3313_v62  ;;  %v1072_v23 = vsub.f32 1.0, %v1071_v14  ;;  %v1096_v63 = vand.u32 2147483648, %v3311_v60 }
 0x140   : > { %2402 = vrcp.f32 %v3311_v60  ;;  %vm1137_vm11 = vcmp.eq.f32.partialorder %v1136_v56, 8.507059e+37 }
 0x141   : > { %v1048_v7 = vadd.f32 %v3280_v5, %v964_v4  ;;  %2404 = vpow2.f32 %v2229_v2  ;;  %v784_v5 = vpop.permute.xlu2 %783  ;;  %v1073_v33 = vmul.f32 %v3323_v8, %v1072_v23 }
 0x142   : > { %2406 = vrcp.f32 %v3319_v3  ;;  %v820_v34 = vmul.f32 %v3287_v6, %v784_v5 }
 0x143   : > { %v2397_v10 = vpop.eup %2396  ;;  %v2227_v11 = vmul.f32 -1.442695, %v1048_v7  ;;  %v1074_v53 = vadd.f32 %v3323_v8, %v1073_v33  ;;  %v1198_v7 = vand.u32 2147483648, %v3319_v3 }
 0x144   : > { %v3327_v12 = vadd.f32 1.0, %v2397_v10  ;;  %v2399_v13 = vpop.eup %2398  ;;  %v1139_v10 = vor.u32 1.1754944e-38, %v1138_v51 }
 0x145   : > { %2408 = vpow2.f32 %v2227_v11  ;;  %v3331_v15 = vpop.eup %2400  ;;  %v3341_v21 = vadd.f32 1.0, %v2399_v13  ;;  %v1078_v45 = vsel %vm3406_vm10, %v3323_v8, %v1074_v53  ;;  %v1278_v13 = vld [vmem:[%s4117_s30 + $0x78] sm:$0xff]  ;;  %v1199_v53 = vor.u32 1.1754944e-38, %v1198_v7 }
 0x146   : > { %2410 = vrcp.f32 %v3327_v12  ;;  %v935_v17 = vpop.f32.mrf.mxu0  ;;  %v1128_v18 = vmul.f32 %v3331_v15, %v3313_v62  ;;  %v3339_v20 = vpop.eup %2402  ;;  %vm1133_vm4 = vweird.f32 %v3331_v15  ;;  %v821_v62 = vmul.f32 %v3287_v6, %v789_v38  ;;  %2247 = vmatmul.msk.f32.gmra.mxu3 %vm845_vm1, %v1278_v13 }
 0x147   : > { %v2405_v22 = vpop.eup %2404  ;;  %2412 = vpow2.f32 %v2230_v16  ;;  %v1086_v27 = vmul.f32 %v3339_v20, %v3311_v60  ;;  %vm3392_vm9 = vmor %vm1132_vm7, %vm1133_vm4  ;;  %vm1091_vm12 = vweird.f32 %v3339_v20  ;;  %v1055_v17 = vld [vmem:[%s3076_s18] sm:$0xff]  ;;  %v1153_v33 = vand.u32 2147483648, %v3327_v12 }
 0x148   : > { %v1129_v24 = vsub.f32 1.0, %v1128_v18  ;;  %v3344_v25 = vpop.eup %2406  ;;  %2414 = vrcp.f32 %v3341_v21  ;;  %v3352_v30 = vadd.f32 1.0, %v2405_v22  ;;  %v1021_v22 = vpop.permute.xlu1 %1020  ;;  %vm1147_vm15 = vweird.f32 %v3327_v12  ;;  %vm3445_vm2 = vmor %vm1090_vm6, %vm1091_vm12 }
 0x149   : > { %v1188_v42 = vmul.f32 %v3344_v25, %v3319_v3  ;;  %v1087_v43 = vsub.f32 1.0, %v1086_v27  ;;  %v1016_v48 = vpop.permute.xlu2 %1015  ;;  %vm1193_vm13 = vweird.f32 %v3344_v25  ;;  %vm3458_vm4 = vcmp.eq.f32.partialorder %v1094_v40, 8.507059e+37  ;;  %v1263_v40 = vld [vmem:[%s4117_s30] sm:$0xff] }
 0x14a   : > { %v1130_v31 = vmul.f32 %v3331_v15, %v1129_v24  ;;  %v1083_v24 = vsel %vm3371_vm3, %v1082_v55, %v1078_v45  ;;  %vm3481_vm5 = vmor %vm1192_vm8, %vm1193_vm13  ;;  %2232 = vmatmul.msk.f32.vlgmr.msra.gmra.mxu1 %vm845_vm1, %v1263_v40  ;;  %vm3492_vm7 = vcmp.eq.f32.partialorder %v1196_v36, 8.507059e+37  ;;  %v1056_v55 = vld [vmem:[%s3076_s18 + $0x8] sm:$0xff]  ;;  %vm1105_vm12 = vweird.f32 %v3341_v21 }
 0x14b   : > { %v2409_v26 = vpop.eup %2408  ;;  %v1189_v57 = vsub.f32 1.0, %v1188_v42  ;;  %v1088_v61 = vmul.f32 %v3339_v20, %v1087_v43  ;;  %v1097_v43 = vor.u32 1.1754944e-38, %v1096_v63  ;;  %v1111_v13 = vand.u32 2147483648, %v3341_v21  ;;  %v1265_v42 = vld [vmem:[%s4117_s30 + $0x10] sm:$0xff] }
 0x14c   : > { %v3349_v29 = vpop.eup %2410  ;;  %v3355_v32 = vadd.f32 1.0, %v2409_v26  ;;  %v1131_v50 = vadd.f32 %v3331_v15, %v1130_v31 }
 0x14d   : > { %v1143_v35 = vmul.f32 %v3349_v29, %v3327_v12  ;;  %v2413_v47 = vpop.eup %2412  ;;  %v1190_v16 = vmul.f32 %v3344_v25, %v1189_v57  ;;  %v1089_v19 = vadd.f32 %v3339_v20, %v1088_v61  ;;  %vm1148_vm14 = vweird.f32 %v3349_v29 }
 0x14e   : > { %2416 = vrcp.f32 %v3355_v32  ;;  %v937_v39 = vpop.f32.mrf.mxu0  ;;  %v3383_v54 = vpop.eup %2414  ;;  %v3388_v58 = vadd.f32 1.0, %v2413_v47  ;;  %v1135_v4 = vsel %vm3392_vm9, %v3331_v15, %v1131_v50  ;;  %vm3452_vm3 = vmor %vm1147_vm15, %vm1148_vm14  ;;  %v1154_v50 = vor.u32 1.1754944e-38, %v1153_v33 }
 0x14f   : > { %v965_v44 = vadd.f32 %v937_v39, %v820_v34  ;;  %2418 = vrcp.f32 %v3352_v30  ;;  %v1144_v49 = vsub.f32 1.0, %v1143_v35  ;;  %v1101_v9 = vmul.f32 %v3383_v54, %v3341_v21  ;;  %v794_v15 = vpop.permute.xlu0 %793 }
 0x150   : > { %v1140_v18 = vsel %vm1137_vm11, %v1139_v10, %v1135_v4  ;;  %v1151_v39 = vand.u32 2147483647, %v3327_v12  ;;  %v1093_v47 = vsel %vm3445_vm2, %v3339_v20, %v1089_v19  ;;  %vm1106_vm8 = vweird.f32 %v3383_v54  ;;  %v1260_v20 = vld [vmem:[%s4139_s20 + $0x68] sm:$0xff] }
 0x151   : > { %v1049_v52 = vadd.f32 %v1016_v48, %v965_v44  ;;  %v1145_v1 = vmul.f32 %v3349_v29, %v1144_v49  ;;  %v1102_v28 = vsub.f32 1.0, %v1101_v9  ;;  %v1232_v35 = vmul.f32 %v1140_v18, %v1055_v17  ;;  %v1264_v17 = vld [vmem:[%s4117_s30 + $0x8] sm:$0xff]  ;;  %vm3530_vm14 = vmor %vm1105_vm12, %vm1106_vm8 }
 0x152   : > { %v1191_v44 = vadd.f32 %v3344_v25, %v1190_v16  ;;  %v822_v49 = vmul.f32 %v3287_v6, %v794_v15  ;;  %vm1152_vm6 = vcmp.eq.f32.partialorder %v1151_v39, 8.507059e+37  ;;  %v1098_v56 = vsel %vm3458_vm4, %v1097_v43, %v1093_v47  ;;  %2233 = vmatmul.msk.f32.gmra.mxu1 %vm845_vm1, %v1264_v17 }
 0x153   : > { %2420 = vtanh.f32 %v1049_v52  ;;  %v1146_v26 = vadd.f32 %v3349_v29, %v1145_v1  ;;  %v1103_v51 = vmul.f32 %v3383_v54, %v1102_v28  ;;  %v1168_v1 = vand.u32 2147483648, %v3355_v32 }
 0x154   : > { %v3398_v0 = vpop.eup %2416  ;;  %2422 = vrcp.f32 %v3388_v58  ;;  %v1195_v36 = vsel %vm3481_vm5, %v3344_v25, %v1191_v44  ;;  %vm1162_vm10 = vweird.f32 %v3355_v32  ;;  %v1109_v25 = vand.u32 2147483647, %v3341_v21 }
 0x155   : > { %v1158_v11 = vmul.f32 %v3398_v0, %v3355_v32  ;;  %v3424_v14 = vpop.eup %2418  ;;  %v1150_v60 = vsel %vm3452_vm3, %v3349_v29, %v1146_v26  ;;  %vm1163_vm9 = vweird.f32 %v3398_v0  ;;  %v1104_v4 = vadd.f32 %v3383_v54, %v1103_v51  ;;  %v1267_v51 = vld [vmem:[%s4117_s30 + $0x20] sm:$0xff]  ;;  %v1249_v29 = vld [vmem:[%s4139_s20 + $0x10] sm:$0xff] }
 0x156   : > { %v940_v5 = vpop.f32.mrf.mxu0  ;;  %v1203_v31 = vmul.f32 %v3424_v14, %v3352_v30  ;;  %v1155_v57 = vsel %vm1152_vm6, %v1154_v50, %v1150_v60  ;;  %vm3512_vm11 = vmor %vm1162_vm10, %vm1163_vm9  ;;  %vm1208_vm13 = vweird.f32 %v3424_v14  ;;  %v1169_v18 = vor.u32 1.1754944e-38, %v1168_v1  ;;  %v1254_v1 = vld [vmem:[%s4139_s20 + $0x38] sm:$0xff] }
 0x157   : > { %v966_v8 = vadd.f32 %v940_v5, %v821_v62  ;;  %v1159_v23 = vsub.f32 1.0, %v1158_v11  ;;  %v1026_v63 = vpop.permute.xlu0 %1025  ;;  %v1233_v9 = vmul.f32 %v1155_v57, %v1056_v55  ;;  %v1166_v11 = vand.u32 2147483647, %v3355_v32  ;;  %v1269_v55 = vld [vmem:[%s4117_s30 + $0x30] sm:$0xff]  ;;  %v1270_v57 = vld [vmem:[%s4117_s30 + $0x38] sm:$0xff] }
 0x158   : > { %v1204_v52 = vsub.f32 1.0, %v1203_v31  ;;  %v1200_v32 = vsel %vm3492_vm7, %v1199_v53, %v1195_v36  ;;  %v1112_v26 = vor.u32 1.1754944e-38, %v1111_v13  ;;  %vm1207_vm2 = vweird.f32 %v3352_v30  ;;  %v1261_v53 = vld [vmem:[%s4139_s20 + $0x70] sm:$0xff] }
 0x159   : > { %v2421_v27 = vpop.eup %2420  ;;  %v1050_v34 = vadd.f32 %v1021_v22, %v966_v8  ;;  %v1160_v46 = vmul.f32 %v3398_v0, %v1159_v23  ;;  %v1108_v22 = vsel %vm3530_vm14, %v3383_v54, %v1104_v4  ;;  %vm1167_vm15 = vcmp.eq.f32.partialorder %v1166_v11, 8.507059e+37  ;;  %vm1209_vm4 = vmor %vm1207_vm2, %vm1208_vm13  ;;  %v1253_v36 = vld [vmem:[%s4139_s20 + $0x30] sm:$0xff]  ;;  %v957_v4 = vpop.f32.mrf.mxu3  ;;  %v1256_v11 = vld [vmem:[%s4139_s20 + $0x48] sm:$0xff] }
 0x15a   : > { %v1235_v37 = vmul.f32 %v2421_v27, %v1083_v24  ;;  %v3473_v48 = vpop.eup %2422  ;;  %v1205_v7 = vmul.f32 %v3424_v14, %v1204_v52  ;;  %v1213_v23 = vand.u32 2147483648, %v3352_v30  ;;  %v1057_v24 = vld [vmem:[%s3076_s18 + $0x10] sm:$0xf]  ;;  %v1211_v28 = vand.u32 2147483647, %v3352_v30  ;;  %2234 = vmatmul.msk.f32.gmra.mxu1 %vm845_vm1, %v1265_v42  ;;  %v1248_v52 = vld [vmem:[%s4139_s20 + $0x8] sm:$0xff] }
 0x15b   : > { %2424 = vtanh.f32 %v1050_v34  ;;  %v1218_v61 = vmul.f32 %v3473_v48, %v3388_v58  ;;  %v1161_v3 = vadd.f32 %v3398_v0, %v1160_v46  ;;  %vm1110_vm3 = vcmp.eq.f32.partialorder %v1109_v25, 8.507059e+37  ;;  %v1257_v25 = vld [vmem:[%s4139_s20 + $0x50] sm:$0xff]  ;;  %s2618_s18 = scalar_lea.hbm %s2617_s1, 24 }
 0x15c   : > { %v1238_v12 = vadd.f32 %v1235_v37, %v1232_v35  ;;  %v1113_v31 = vsel %vm1110_vm3, %v1112_v26, %v1108_v22  ;;  %v1214_v38 = vor.u32 1.1754944e-38, %v1213_v23  ;;  %vm1212_vm5 = vcmp.eq.f32.partialorder %v1211_v28, 8.507059e+37  ;;  %p2619_p6 = scmp.ne.s32.totalorder %s2617_s1, %s2618_s18  ;;  %p2624_p8 = scmp.lt.s32.totalorder %s2622_s0, %s2618_s18 }
 0x15d   : > { %v1165_v16 = vsel %vm3512_vm11, %v3398_v0, %v1161_v3  ;;  %v1219_v8 = vsub.f32 1.0, %v1218_v61  ;;  %v1206_v0 = vadd.f32 %v3424_v14, %v1205_v7  ;;  %vm1223_vm6 = vweird.f32 %v3473_v48  ;;  %v1271_v61 = vld [vmem:[%s4117_s30 + $0x40] sm:$0xff]  ;;  %v1272_v3 = vld [vmem:[%s4117_s30 + $0x48] sm:$0xff]  ;;  %v1262_v7 = vld [vmem:[%s4139_s20 + $0x78] sm:$0xff] }
 0x15e   : > { %1824 = vst [vmem:[%s3487_s9] sm:$0xff] %v1238_v12  ;;  %v943_v6 = vpop.f32.mrf.mxu0  ;;  %2426 = vtanh.f32 %v1238_v12  ;;  %v1170_v27 = vsel %vm1167_vm15, %v1169_v18, %v1165_v16  ;;  %vm1222_vm7 = vweird.f32 %v3388_v58  ;;  %v1226_v46 = vand.u32 2147483647, %v3388_v58  ;;  %p2620_p0 = pnand %p2619_p6, %p2945_p10  ;;  %p2625_p9 = por %p2624_p8, %p2623_p7 }
 0x15f   : > { %v967_v59 = vadd.f32 %v943_v6, %v822_v49  ;;  %v1220_v33 = vmul.f32 %v3473_v48, %v1219_v8  ;;  %v1210_v34 = vsel %vm1209_vm4, %v3424_v14, %v1206_v0  ;;  %v1234_v35 = vmul.f32 %v1170_v27, %v1057_v24  ;;  %vm1224_vm8 = vmor %vm1222_vm7, %vm1223_vm6  ;;  %v1266_v49 = vld [vmem:[%s4117_s30 + $0x18] sm:$0xff]  ;;  %v1268_v6 = vld [vmem:[%s4117_s30 + $0x28] sm:$0xff] }
 0x160   : > { %v1215_v41 = vsel %vm1212_vm5, %v1214_v38, %v1210_v34  ;;  %v1228_v14 = vand.u32 2147483648, %v3388_v58  ;;  %vm1227_vm9 = vcmp.eq.f32.partialorder %v1226_v46, 8.507059e+37  ;;  %v1247_v58 = vld [vmem:[%s4138_s28] sm:$0xff]  ;;  %p2621_p13 = pneg %p2620_p0 }
 0x161   : > { %v2425_v62 = vpop.eup %2424  ;;  %v1051_v2 = vadd.f32 %v1026_v63, %v967_v59  ;;  %v1221_v43 = vadd.f32 %v3473_v48, %v1220_v33  ;;  %v1251_v59 = vld [vmem:[%s4139_s20 + $0x20] sm:$0xff]  ;;  %v1252_v63 = vld [vmem:[%s4139_s20 + $0x28] sm:$0xff] }
 0x162   : > { %v1236_v10 = vmul.f32 %v2425_v62, %v1098_v56  ;;  %v1229_v47 = vor.u32 1.1754944e-38, %v1228_v14  ;;  %2235 = vmatmul.msk.f32.gmra.mxu1 %vm845_vm1, %v1266_v49  ;;  %v1250_v56 = vld [vmem:[%s4139_s20 + $0x18] sm:$0xff]  ;;  %v1273_v62 = vld [vmem:[%s4117_s30 + $0x50] sm:$0xff]  ;;  %p2626_p1 = pnand %p2625_p9, %p2621_p13 }
 0x163   : > { %2428 = vtanh.f32 %v1051_v2  ;;  %v1225_v12 = vsel %vm1224_vm8, %v3473_v48, %v1221_v43  ;;  %v1259_v48 = vld [vmem:[%s4139_s20 + $0x60] sm:$0xff] }
 0x164   : > { %v2427_v15 = vpop.eup %2426  ;;  %v1239_v5 = vadd.f32 %v1236_v10, %v1233_v9  ;;  %v1230_v40 = vsel %vm1227_vm9, %v1229_v47, %v1225_v12  ;;  %v1255_v2 = vld [vmem:[%s4139_s20 + $0x40] sm:$0xff]  ;;  %v837_v9 = vld [vmem:[%s4044_s6 + $0x58] sm:$0xff] }
 0x165   : > { %v1244_v19 = vmul.f32 %v2427_v15, %v1200_v32  ;;  %v1274_v10 = vld [vmem:[%s4117_s30 + $0x58] sm:$0xff]  ;;  %2217 = vmatmul.msk.f32.gmra.mxu0 %vm845_vm1, %v837_v9 }
 0x166   : > { %1825 = vst [vmem:[%s3487_s9 + $0x8] sm:$0xff] %v1239_v5  ;;  %2430 = vtanh.f32 %v1239_v5  ;;  %v1258_v15 = vld [vmem:[%s4139_s20 + $0x58] sm:$0xff] }
 0x167   : > { %1821 = vst [vmem:[%s3545_s12] sm:$0xff] %v1244_v19 }
 0x169   : > { %v2429_v54 = vpop.eup %2428 }
 0x16a   : > { %v1237_v37 = vmul.f32 %v2429_v54, %v1113_v31  ;;  %2236 = vmatmul.msk.f32.gmra.mxu1 %vm845_vm1, %v1267_v51 }
 0x16c   : > { %v2431_v30 = vpop.eup %2430  ;;  %v1240_v39 = vadd.f32 %v1237_v37, %v1234_v35 }
 0x16d   : > { %v1245_v44 = vmul.f32 %v2431_v30, %v1215_v41 }
 0x16e   : > { %1826 = vst [vmem:[%s3487_s9 + $0x10] sm:$0xf] %v1240_v39  ;;  %2432 = vtanh.f32 %v1240_v39 }
 0x16f   : > { %1822 = vst [vmem:[%s3545_s12 + $0x8] sm:$0xff] %v1245_v44 }
 0x172   : > { %2237 = vmatmul.msk.f32.gmra.mxu1 %vm845_vm1, %v1268_v6 }
 0x174   : > { %v2433_v60 = vpop.eup %2432 }
 0x175   : > { %v1246_v50 = vmul.f32 %v2433_v60, %v1230_v40 }
 0x177   : > { %2248 = vmatpush.msk.msra.mxu2 %vm894_vm0, %v1246_v50  ;;  %1823 = vst [vmem:[%s3545_s12 + $0x10] sm:$0xf] %v1246_v50  ;;  %2286 = vmatpush.msk.msra.mxu3 %vm894_vm0, %v1246_v50 }
 0x179   : > { %1459 = vmatpush.msra.mxu2 %v1245_v44  ;;  %2287 = vmatpush.msra.mxu3 %v1245_v44 }
 0x17a   : > { %2238 = vmatmul.msk.f32.gmra.mxu1 %vm845_vm1, %v1269_v55 }
 0x17b   : > { %1460 = vmatpush.msra.mxu2 %v1244_v19  ;;  %2288 = vmatpush.msra.mxu3 %v1244_v19 }
 0x17c   : > { %2249 = vmatmul.msk.f32.vlgmr.msra.gmra.mxu2 %vm845_vm1, %v1247_v58  ;;  %2261 = vmatmul.msk.f32.vlgmr.msra.gmra.mxu3 %vm845_vm1, %v1259_v48 }
 0x182   : > { %2239 = vmatmul.msk.f32.gmra.mxu1 %vm845_vm1, %v1270_v57 }
 0x184   : > { %2250 = vmatmul.msk.f32.gmra.mxu2 %vm845_vm1, %v1248_v52  ;;  %2262 = vmatmul.msk.f32.gmra.mxu3 %vm845_vm1, %v1260_v20 }
 0x18a   : > { %2240 = vmatmul.msk.f32.gmra.mxu1 %vm845_vm1, %v1271_v61 }
 0x18c   : > { %2251 = vmatmul.msk.f32.gmra.mxu2 %vm845_vm1, %v1249_v29  ;;  %2263 = vmatmul.msk.f32.gmra.mxu3 %vm845_vm1, %v1261_v53 }
 0x192   : > { %2241 = vmatmul.msk.f32.gmra.mxu1 %vm845_vm1, %v1272_v3 }
 0x194   : > { %2252 = vmatmul.msk.f32.gmra.mxu2 %vm845_vm1, %v1250_v56  ;;  %2264 = vmatmul.msk.f32.gmra.mxu3 %vm845_vm1, %v1262_v7 }
 0x19a   : > { %2242 = vmatmul.msk.f32.gmra.mxu1 %vm845_vm1, %v1273_v62 }
 0x19c   : > { %2253 = vmatmul.msk.f32.gmra.mxu2 %vm845_vm1, %v1251_v59 }
 0x19d   : > { %v3662_v45 = vpop.f32.mrf.mxu3 }
 0x1a2   : > { %2243 = vmatmul.msk.f32.gmra.mxu1 %vm845_vm1, %v1274_v10 }
 0x1a4   : > { %2254 = vmatmul.msk.f32.gmra.mxu2 %vm845_vm1, %v1252_v63 }
 0x1a5   : > { %v3668_v13 = vpop.f32.mrf.mxu3 }
 0x1ac   : > { %2255 = vmatmul.msk.f32.gmra.mxu2 %vm845_vm1, %v1253_v36 }
 0x1ad   : > { %v3674_v5 = vpop.f32.mrf.mxu3 }
 0x1b4   : > { %2256 = vmatmul.msk.f32.gmra.mxu2 %vm845_vm1, %v1254_v1 }
 0x1bc   : > { %2257 = vmatmul.msk.f32.gmra.mxu2 %vm845_vm1, %v1255_v2 }
 0x1c4   : > { %2258 = vmatmul.msk.f32.gmra.mxu2 %vm845_vm1, %v1256_v11 }
 0x1c7   : > { %v1350_v32 = vpop.f32.mrf.mxu1 }
 0x1c9   : > { %v1392_v16 = vpop.f32.mrf.mxu3 }
 0x1cc   : > { %2259 = vmatmul.msk.f32.gmra.mxu2 %vm845_vm1, %v1257_v25 }
 0x1d4   : > { %2260 = vmatmul.msk.f32.gmra.mxu2 %vm845_vm1, %v1258_v15 }
 0x1d5   : > { %2629 = shalt.err (!%p2626_p1)
}
 0x1d6   : > { %s4081_s28 = smov 128   ;;  %s4083_s19 = smov 384   ;;  %v1353_v17 = vpop.f32.mrf.mxu1 }
 0x1d7   : > { %s2804_s8 = smov 8   ;;  %s1893_s3 = sshll.u32 %s3487_s9, 4  ;;  %s1894_s3 = int_to_ptr.vmem [resolvable:$true] %s1893_s3 }
 0x1d8   : > { %2303 = dma.vmem_to_hbm [thread:$0]  (%p2945_p10), %s1878_s15, 384, %s1880_s13, %s4080_s24, %s4081_s28, %s4083_s19, %s2804_s8  }
 0x1d9   : > { %s4142_s18 = sld [smem:[#allocation41_spill]] }
 0x1de   : > { %v1356_v18 = vpop.f32.mrf.mxu1 }
 0x1df   : > { %s1892_s11 = scalar_lea.hbm %s4142_s18, %s3679_s26  ;;  %s2650_s9 = scalar_lea.hbm %s4142_s18, 72 }
 0x1e0   : > { %s1895_s12 = sshll.u32 %s1892_s11, 4  ;;  %s1896_s12 = int_to_ptr.hbm [resolvable:$true] %s1895_s12 }
 0x1e1   : > { %s2644_s0 = sshra.s32 %s1896_s12, 4  ;;  %s2645_s0 = int_to_ptr.hbm [resolvable:$true] %s2644_s0 }
 0x1e2   : > { %s2646_s2 = scalar_lea.hbm %s2645_s0, 24  ;;  %p2651_p5 = scmp.lt.s32.totalorder %s2645_s0, %s4142_s18 }
 0x1e3   : > { %p2647_p2 = scmp.ne.s32.totalorder %s2645_s0, %s2646_s2  ;;  %p2652_p12 = scmp.lt.s32.totalorder %s2650_s9, %s2646_s2 }
 0x1e5   : > { %p2648_p3 = pnand %p2647_p2, %p2945_p10  ;;  %p2653_p6 = por %p2652_p12, %p2651_p5 }
 0x1e6   : > { %v1359_v21 = vpop.f32.mrf.mxu1 }
 0x1e7   : > { %p2649_p4 = pneg %p2648_p3 }
 0x1e9   : > { %p2654_p0 = pnand %p2653_p6, %p2649_p4 }
 0x1ff   : > { %v1462_v8 = vpop.f32.mrf.mxu2 }
 0x200   : > { %2657 = shalt.err (!%p2654_p0)
}
 0x201   : > { %s4143_s4 = smov 128   ;;  %s4144_s1 = scalar_lea.sflag [#allocation13], %s3072_s14  ;;  %v1361_v0 = vpop.f32.mrf.mxu1  ;;  %v1521_v22 = vpop.permute.xlu0 %1520  ;;  %v1463_v27 = vadd.f32 %v1462_v8, %v1350_v32 }
 0x202   : > { %2304 = dma.vmem_to_hbm [thread:$0]  (%p2945_p10), %s1894_s3, 384, %s1896_s12, %s4144_s1, %s4143_s4, %s4083_s19, %s2804_s8   ;;  %v1526_v54 = vpop.permute.xlu1 %1525  ;;  %v1495_v33 = vpop.f32.mrf.mxu3 }
 0x203   : > { %v1578_v31 = vadd.f32 %v1521_v22, %v1463_v27  ;;  %v1496_v35 = vadd.f32 %v1495_v33, %v3662_v45  ;;  %v1536_v43 = vpop.permute.xlu2 %1535  ;;  %v946_v33 = vpop.f32.mrf.mxu0  ;;  %s3883_s2 = scalar_lea.vmem [#allocation17], %s3063_s25  ;;  %s3932_s24 = scalar_lea.vmem [#allocation15], %s3063_s25 }
 0x204   : > { %s4163_s28 = sld [smem:[#allocation42_spill]]  ;;  %s1909_s9 = sshll.u32 %s3932_s24, 4  ;;  %s1910_s9 = int_to_ptr.vmem [resolvable:$true] %s1909_s9 }
 0x205   : > { %v2265_v37 = vmul.f32 -1.442695, %v1578_v31  ;;  %s4165_s15 = sld [smem:[#allocation43_spill]]  ;;  %s1925_s25 = sshll.u32 %s3883_s2, 4  ;;  %s3962_s25 = int_to_ptr.vmem [resolvable:$true] %s1925_s25 }
 0x207   : > { %v1465_v19 = vpop.f32.mrf.mxu2  ;;  %2434 = vpow2.f32 %v2265_v37 }
 0x208   : > { %v1466_v30 = vadd.f32 %v1465_v19, %v1353_v17 }
 0x209   : > { %v1364_v23 = vpop.f32.mrf.mxu1  ;;  %v1541_v26 = vpop.permute.xlu0 %1540 }
 0x20a   : > { %v1531_v41 = vpop.permute.xlu1 %1530  ;;  %v1579_v14 = vadd.f32 %v1526_v54, %v1466_v30  ;;  %v1498_v47 = vpop.f32.mrf.mxu3  ;;  %s4164_s3 = smov %s4163_s28  ;;  %s1908_s11 = scalar_lea.hbm %s4163_s28, %s3679_s26 }
 0x20b   : > { %v1499_v48 = vadd.f32 %v1498_v47, %v3668_v13  ;;  %v1546_v55 = vpop.permute.xlu2 %1545  ;;  %s1924_s13 = scalar_lea.hbm %s4165_s15, %s3679_s26  ;;  %s3956_s1 = sshll.u32 %s1908_s11, 4  ;;  %s1912_s1 = int_to_ptr.hbm [resolvable:$true] %s3956_s1 }
 0x20c   : > { %v2266_v50 = vmul.f32 -1.442695, %v1579_v14  ;;  %s1848_s26 = scalar_lea.sflag [#allocation16], %s3072_s14  ;;  %s2672_s28 = sshra.s32 %s1912_s1, 4  ;;  %s2673_s28 = int_to_ptr.hbm [resolvable:$true] %s2672_s28 }
 0x20d   : > { %v2435_v58 = vpop.eup %2434  ;;  %s2674_s11 = scalar_lea.hbm %s2673_s28, 24  ;;  %s2678_s0 = scalar_lea.hbm %s4164_s3, 72 }
 0x20e   : > { %v3725_v29 = vadd.f32 1.0, %v2435_v58  ;;  %p2675_p13 = scmp.ne.s32.totalorder %s2673_s28, %s2674_s11  ;;  %p2679_p9 = scmp.lt.s32.totalorder %s2673_s28, %s4164_s3 }
 0x20f   : > { %v1468_v24 = vpop.f32.mrf.mxu2  ;;  %p2680_p1 = scmp.lt.s32.totalorder %s2678_s0, %s2674_s11 }
 0x210   : > { %v1469_v60 = vadd.f32 %v1468_v24, %v1356_v18  ;;  %vm1610_vm1 = vweird.f32 %v3725_v29  ;;  %p2676_p7 = pnand %p2675_p13, %p2945_p10 }
 0x211   : > { %v1367_v28 = vpop.f32.mrf.mxu1  ;;  %v1566_v39 = vpop.permute.xlu0 %1565  ;;  %p2681_p2 = por %p2680_p1, %p2679_p9 }
 0x212   : > { %v1587_v42 = vadd.f32 %v1566_v39, %v1496_v35  ;;  %v1580_v52 = vadd.f32 %v1531_v41, %v1469_v60  ;;  %v1571_v6 = vpop.permute.xlu1 %1570  ;;  %v1501_v1 = vpop.f32.mrf.mxu3  ;;  %p2677_p8 = pneg %p2676_p7 }
 0x213   : > { %v1588_v56 = vadd.f32 %v1571_v6, %v1499_v48  ;;  %v1502_v10 = vadd.f32 %v1501_v1, %v3674_v5  ;;  %v1576_v15 = vpop.permute.xlu2 %1575 }
 0x214   : > { %v2271_v12 = vmul.f32 -1.442695, %v1587_v42  ;;  %v2267_v59 = vmul.f32 -1.442695, %v1580_v52  ;;  %p2682_p3 = pnand %p2681_p2, %p2677_p8 }
 0x215   : > { %v2272_v62 = vmul.f32 -1.442695, %v1588_v56  ;;  %v1589_v17 = vadd.f32 %v1576_v15, %v1502_v10 }
 0x216   : > { %2436 = vpow2.f32 %v2271_v12 }
 0x217   : > { %v1471_v34 = vpop.f32.mrf.mxu2  ;;  %v2273_v24 = vmul.f32 -1.442695, %v1589_v17 }
 0x219   : > { %v1370_v38 = vpop.f32.mrf.mxu1 }
 0x21a   : > { %v1504_v12 = vpop.f32.mrf.mxu3 }
 0x21c   : > { %v2437_v63 = vpop.eup %2436 }
 0x21d   : > { %v3732_v9 = vadd.f32 1.0, %v2437_v63 }
 0x21f   : > { %v1473_v44 = vpop.f32.mrf.mxu2  ;;  %v1731_v47 = vand.u32 2147483647, %v3732_v9  ;;  %vm1727_vm3 = vweird.f32 %v3732_v9 }
 0x220   : > { %v1474_v46 = vadd.f32 %v1473_v44, %v1361_v0 }
 0x221   : > { %v3722_v49 = vpop.f32.mrf.mxu1 }
 0x222   : > { %v1581_v40 = vadd.f32 %v1536_v43, %v1474_v46  ;;  %v1614_v46 = vand.u32 2147483647, %v3725_v29 }
 0x224   : > { %v2268_v51 = vmul.f32 -1.442695, %v1581_v40  ;;  %v1616_v40 = vand.u32 2147483648, %v3725_v29  ;;  %vm3798_vm14 = vcmp.eq.f32.partialorder %v1614_v46, 8.507059e+37 }
 0x226   : > { %2438 = vpow2.f32 %v2268_v51 }
 0x227   : > { %v1476_v20 = vpop.f32.mrf.mxu2  ;;  %2440 = vpow2.f32 %v2266_v50  ;;  %v1551_v50 = vpop.permute.xlu0 %1550 }
 0x228   : > { %v1477_v53 = vadd.f32 %v1476_v20, %v1364_v23  ;;  %2442 = vrcp.f32 %v3725_v29  ;;  %v1733_v20 = vand.u32 2147483648, %v3732_v9 }
 0x229   : > { %v3727_v61 = vpop.f32.mrf.mxu1 }
 0x22a   : > { %v1582_v57 = vadd.f32 %v1541_v26, %v1477_v53 }
 0x22c   : > { %v2269_v3 = vmul.f32 -1.442695, %v1582_v57  ;;  %v2439_v36 = vpop.eup %2438 }
 0x22d   : > { %v2441_v2 = vpop.eup %2440  ;;  %v3730_v4 = vadd.f32 1.0, %v2439_v36 }
 0x22e   : > { %2444 = vpow2.f32 %v2269_v3  ;;  %v3736_v45 = vadd.f32 1.0, %v2441_v2  ;;  %v3738_v25 = vpop.eup %2442 }
 0x22f   : > { %2446 = vpow2.f32 %v2267_v59  ;;  %v1479_v7 = vpop.f32.mrf.mxu2  ;;  %v1606_v5 = vmul.f32 %v3738_v25, %v3725_v29  ;;  %vm1611_vm10 = vweird.f32 %v3738_v25  ;;  %v1673_v53 = vand.u32 2147483648, %v3730_v4 }
 0x230   : > { %2448 = vrcp.f32 %v3730_v4  ;;  %v1480_v11 = vadd.f32 %v1479_v7, %v1367_v28  ;;  %vm1667_vm12 = vweird.f32 %v3730_v4  ;;  %vm3794_vm13 = vmor %vm1610_vm1, %vm1611_vm10  ;;  %v1671_v63 = vand.u32 2147483647, %v3730_v4 }
 0x231   : > { %2450 = vpow2.f32 %v2272_v62  ;;  %v3740_v16 = vpop.f32.mrf.mxu1  ;;  %v1607_v26 = vsub.f32 1.0, %v1606_v5  ;;  %v1617_v29 = vor.u32 1.1754944e-38, %v1616_v40  ;;  %v1629_v62 = vand.u32 2147483647, %v3736_v45  ;;  %v1590_v5 = vld [vmem:[%s3087_s22] sm:$0xff] }
 0x232   : > { %v1583_v13 = vadd.f32 %v1546_v55, %v1480_v11  ;;  %2452 = vrcp.f32 %v3732_v9  ;;  %vm1672_vm4 = vcmp.eq.f32.partialorder %v1671_v63, 8.507059e+37  ;;  %vm1625_vm9 = vweird.f32 %v3736_v45 }
 0x233   : > { %2454 = vrcp.f32 %v3736_v45  ;;  %v1608_v41 = vmul.f32 %v3738_v25, %v1607_v26  ;;  %vm3854_vm1 = vcmp.eq.f32.partialorder %v1731_v47, 8.507059e+37  ;;  %v1734_v40 = vor.u32 1.1754944e-38, %v1733_v20 }
 0x234   : > { %v2445_v32 = vpop.eup %2444  ;;  %v2270_v18 = vmul.f32 -1.442695, %v1583_v13  ;;  %v1674_v13 = vor.u32 1.1754944e-38, %v1673_v53 }
 0x235   : > { %v2447_v21 = vpop.eup %2446  ;;  %v3746_v8 = vadd.f32 1.0, %v2445_v32  ;;  %v1609_v48 = vadd.f32 %v3738_v25, %v1608_v41 }
 0x236   : > { %v3748_v0 = vpop.eup %2448  ;;  %2456 = vpow2.f32 %v2270_v18  ;;  %v3753_v27 = vadd.f32 1.0, %v2447_v21 }
 0x237   : > { %v2451_v19 = vpop.eup %2450  ;;  %v1663_v22 = vmul.f32 %v3748_v0, %v3730_v4  ;;  %2458 = vrcp.f32 %v3746_v8  ;;  %v1482_v23 = vpop.f32.mrf.mxu2  ;;  %vm1668_vm11 = vweird.f32 %v3748_v0  ;;  %v1613_v7 = vsel %vm3794_vm13, %v3738_v25, %v1609_v48 }
 0x238   : > { %v3755_v54 = vpop.eup %2452  ;;  %v3757_v31 = vadd.f32 1.0, %v2451_v19  ;;  %2460 = vpow2.f32 %v2273_v24  ;;  %vm3808_vm2 = vmor %vm1667_vm12, %vm1668_vm11  ;;  %v1631_v25 = vand.u32 2147483648, %v3736_v45  ;;  %v1556_v23 = vpop.permute.xlu1 %1555  ;;  %vm1682_vm7 = vweird.f32 %v3746_v8 }
 0x239   : > { %v1664_v28 = vsub.f32 1.0, %v1663_v22  ;;  %v3759_v34 = vpop.eup %2454  ;;  %v1381_v35 = vpop.f32.mrf.mxu1  ;;  %2462 = vrcp.f32 %v3753_v27  ;;  %v1723_v44 = vmul.f32 %v3755_v54, %v3732_v9  ;;  %vm1728_vm15 = vweird.f32 %v3755_v54  ;;  %v1591_v9 = vld [vmem:[%s3087_s22 + $0x8] sm:$0xff] }
 0x23a   : > { %v1621_v42 = vmul.f32 %v3759_v34, %v3736_v45  ;;  %2464 = vrcp.f32 %v3757_v31  ;;  %vm1626_vm5 = vweird.f32 %v3759_v34  ;;  %v1688_v35 = vand.u32 2147483648, %v3746_v8  ;;  %vm3878_vm11 = vmor %vm1727_vm3, %vm1728_vm15 }
 0x23b   : > { %v1665_v30 = vmul.f32 %v3748_v0, %v1664_v28  ;;  %v1724_v56 = vsub.f32 1.0, %v1723_v44  ;;  %vm3861_vm10 = vmor %vm1625_vm9, %vm1626_vm5  ;;  %vm1630_vm12 = vcmp.eq.f32.partialorder %v1629_v62, 8.507059e+37  ;;  %vm1640_vm5 = vweird.f32 %v3753_v27 }
 0x23c   : > { %v2457_v37 = vpop.eup %2456  ;;  %v1622_v6 = vsub.f32 1.0, %v1621_v42 }
 0x23d   : > { %v3761_v38 = vpop.eup %2458  ;;  %v3765_v39 = vadd.f32 1.0, %v2457_v37  ;;  %v1666_v51 = vadd.f32 %v3748_v0, %v1665_v30  ;;  %v1725_v17 = vmul.f32 %v3755_v54, %v1724_v56 }
 0x23e   : > { %v1678_v43 = vmul.f32 %v3761_v38, %v3746_v8  ;;  %v2461_v52 = vpop.eup %2460  ;;  %v1623_v32 = vmul.f32 %v3759_v34, %v1622_v6  ;;  %vm1683_vm6 = vweird.f32 %v3761_v38 }
 0x23f   : > { %2466 = vrcp.f32 %v3765_v39  ;;  %v1484_v14 = vpop.f32.mrf.mxu2  ;;  %v3815_v2 = vadd.f32 1.0, %v2461_v52  ;;  %v1670_v10 = vsel %vm3808_vm2, %v3748_v0, %v1666_v51  ;;  %v1618_v0 = vsel %vm3798_vm14, %v1617_v29, %v1613_v7  ;;  %vm3847_vm8 = vmor %vm1682_vm7, %vm1683_vm6 }
 0x240   : > { %v1485_v60 = vadd.f32 %v1484_v14, %v3722_v49  ;;  %v1679_v58 = vsub.f32 1.0, %v1678_v43  ;;  %v3787_v49 = vpop.eup %2462  ;;  %v1675_v19 = vsel %vm1672_vm4, %v1674_v13, %v1670_v10  ;;  %v1624_v30 = vadd.f32 %v3759_v34, %v1623_v32 }
 0x241   : > { %v3803_v3 = vpop.eup %2464  ;;  %v1636_v11 = vmul.f32 %v3787_v49, %v3753_v27  ;;  %v1767_v41 = vmul.f32 %v1675_v19, %v1590_v5  ;;  %v1726_v43 = vadd.f32 %v3755_v54, %v1725_v17  ;;  %vm1641_vm15 = vweird.f32 %v3787_v49 }
 0x242   : > { %v1584_v55 = vadd.f32 %v1551_v50, %v1485_v60  ;;  %v1680_v4 = vmul.f32 %v3761_v38, %v1679_v58  ;;  %v1738_v21 = vmul.f32 %v3803_v3, %v3757_v31  ;;  %v1689_v50 = vor.u32 1.1754944e-38, %v1688_v35  ;;  %vm3919_vm6 = vmor %vm1640_vm5, %vm1641_vm15 }
 0x243   : > { %v1637_v33 = vsub.f32 1.0, %v1636_v11  ;;  %v1628_v47 = vsel %vm3861_vm10, %v3759_v34, %v1624_v30  ;;  %v1730_v52 = vsel %vm3878_vm11, %v3755_v54, %v1726_v43  ;;  %v1703_v54 = vand.u32 2147483648, %v3765_v39 }
 0x244   : > { %2468 = vtanh.f32 %v1584_v55  ;;  %v1681_v26 = vadd.f32 %v3761_v38, %v1680_v4  ;;  %v1739_v44 = vsub.f32 1.0, %v1738_v21  ;;  %v1561_v55 = vpop.permute.xlu2 %1560  ;;  %vm1697_vm2 = vweird.f32 %v3765_v39 }
 0x245   : > { %v3813_v1 = vpop.eup %2466  ;;  %2470 = vrcp.f32 %v3815_v2  ;;  %v1638_v58 = vmul.f32 %v3787_v49, %v1637_v33  ;;  %v1701_v4 = vand.u32 2147483647, %v3765_v39  ;;  %v1735_v7 = vsel %vm3854_vm1, %v1734_v40, %v1730_v52 }
 0x246   : > { %v1693_v15 = vmul.f32 %v3813_v1, %v3765_v39  ;;  %v1685_v45 = vsel %vm3847_vm8, %v3761_v38, %v1681_v26  ;;  %v1632_v38 = vor.u32 1.1754944e-38, %v1631_v25  ;;  %v1740_v20 = vmul.f32 %v3803_v3, %v1739_v44  ;;  %v1793_v44 = vpop.permute.xlu1 %1792 }
 0x247   : > { %v1487_v18 = vpop.f32.mrf.mxu2  ;;  %vm1698_vm14 = vweird.f32 %v3813_v1  ;;  %v1639_v29 = vadd.f32 %v3787_v49, %v1638_v58  ;;  %vm1743_vm3 = vweird.f32 %v3803_v3  ;;  %v1646_v11 = vand.u32 2147483648, %v3753_v27 }
 0x248   : > { %v1488_v22 = vadd.f32 %v1487_v18, %v3727_v61  ;;  %v1694_v24 = vsub.f32 1.0, %v1693_v15  ;;  %v1686_v61 = vand.u32 2147483647, %v3746_v8  ;;  %v1633_v56 = vsel %vm1630_vm12, %v1632_v38, %v1628_v47  ;;  %vm3906_vm4 = vmor %vm1697_vm2, %vm1698_vm14 }
 0x249   : > { %v1644_v39 = vand.u32 2147483647, %v3753_v27  ;;  %v1741_v17 = vadd.f32 %v3803_v3, %v1740_v20  ;;  %v1704_v25 = vor.u32 1.1754944e-38, %v1703_v54  ;;  %v1643_v27 = vsel %vm3919_vm6, %v3787_v49, %v1639_v29 }
 0x24a   : > { %v2469_v28 = vpop.eup %2468  ;;  %v1585_v37 = vadd.f32 %v1556_v23, %v1488_v22  ;;  %v1695_v12 = vmul.f32 %v3813_v1, %v1694_v24  ;;  %vm1687_vm13 = vcmp.eq.f32.partialorder %v1686_v61, 8.507059e+37  ;;  %vm1702_vm7 = vcmp.eq.f32.partialorder %v1701_v4, 8.507059e+37  ;;  %v1592_v22 = vld [vmem:[%s3087_s22 + $0x10] sm:$0xf]  ;;  %s3959_s22 = sshll.u32 %s1924_s13, 4  ;;  %s1928_s22 = int_to_ptr.hbm [resolvable:$true] %s3959_s22 }
 0x24b   : > { %v1770_v42 = vmul.f32 %v2469_v28, %v1618_v0  ;;  %v3872_v48 = vpop.eup %2470  ;;  %v1690_v6 = vsel %vm1687_vm13, %v1689_v50, %v1685_v45  ;;  %v1748_v0 = vand.u32 2147483648, %v3757_v31  ;;  %vm1742_vm8 = vweird.f32 %v3757_v31 }
 0x24c   : > { %2472 = vtanh.f32 %v1585_v37  ;;  %v1696_v57 = vadd.f32 %v3813_v1, %v1695_v12  ;;  %v1753_v63 = vmul.f32 %v3872_v48, %v3815_v2  ;;  %v1746_v19 = vand.u32 2147483647, %v3757_v31  ;;  %vm1744_vm9 = vmor %vm1742_vm8, %vm1743_vm3  ;;  %v1798_v58 = vpop.permute.xlu2 %1797 }
 0x24d   : > { %v1773_v8 = vadd.f32 %v1770_v42, %v1767_v41  ;;  %v1647_v23 = vor.u32 1.1754944e-38, %v1646_v11  ;;  %vm1645_vm1 = vcmp.eq.f32.partialorder %v1644_v39, 8.507059e+37  ;;  %v1745_v49 = vsel %vm1744_vm9, %v3803_v3, %v1741_v17  ;;  %v1788_v3 = vpop.permute.xlu0 %1787 }
 0x24e   : > { %v1700_v32 = vsel %vm3906_vm4, %v3813_v1, %v1696_v57  ;;  %v1754_v18 = vsub.f32 1.0, %v1753_v63  ;;  %v1749_v35 = vor.u32 1.1754944e-38, %v1748_v0  ;;  %vm1747_vm10 = vcmp.eq.f32.partialorder %v1746_v19, 8.507059e+37 }
 0x24f   : > { %2474 = vtanh.f32 %v1773_v8  ;;  %1830 = vst [vmem:[%s3883_s2] sm:$0xff] %v1773_v8  ;;  %v1490_v34 = vpop.f32.mrf.mxu2  ;;  %v1705_v24 = vsel %vm1702_vm7, %v1704_v25, %v1700_v32  ;;  %v1648_v33 = vsel %vm1645_vm1, %v1647_v23, %v1643_v27  ;;  %vm1758_vm11 = vweird.f32 %v3872_v48 }
 0x250   : > { %v1491_v53 = vadd.f32 %v1490_v34, %v3740_v16  ;;  %v1768_v16 = vmul.f32 %v1690_v6, %v1591_v9  ;;  %v1755_v28 = vmul.f32 %v3872_v48, %v1754_v18  ;;  %v1769_v31 = vmul.f32 %v1705_v24, %v1592_v22 }
 0x251   : > { %v1750_v41 = vsel %vm1747_vm10, %v1749_v35, %v1745_v49  ;;  %v1763_v14 = vand.u32 2147483648, %v3815_v2  ;;  %vm1757_vm12 = vweird.f32 %v3815_v2  ;;  %v1761_v46 = vand.u32 2147483647, %v3815_v2 }
 0x252   : > { %v2473_v59 = vpop.eup %2472  ;;  %v1586_v36 = vadd.f32 %v1561_v55, %v1491_v53  ;;  %v1756_v61 = vadd.f32 %v3872_v48, %v1755_v28  ;;  %vm1759_vm13 = vmor %vm1757_vm12, %vm1758_vm11 }
 0x253   : > { %v1771_v62 = vmul.f32 %v2473_v59, %v1633_v56  ;;  %v1764_v40 = vor.u32 1.1754944e-38, %v1763_v14  ;;  %vm1762_vm14 = vcmp.eq.f32.partialorder %v1761_v46, 8.507059e+37 }
 0x254   : > { %2476 = vtanh.f32 %v1586_v36  ;;  %v1760_v60 = vsel %vm1759_vm13, %v3872_v48, %v1756_v61 }
 0x255   : > { %v2475_v13 = vpop.eup %2474  ;;  %v1774_v15 = vadd.f32 %v1771_v62, %v1768_v16  ;;  %v1765_v50 = vsel %vm1762_vm14, %v1764_v40, %v1760_v60 }
 0x256   : > { %v1779_v21 = vmul.f32 %v2475_v13, %v1735_v7 }
 0x257   : > { %2478 = vtanh.f32 %v1774_v15  ;;  %1831 = vst [vmem:[%s3883_s2 + $0x8] sm:$0xff] %v1774_v15  ;;  %v1493_v1 = vpop.f32.mrf.mxu2 }
 0x258   : > { %1827 = vst [vmem:[%s3932_s24] sm:$0xff] %v1779_v21  ;;  %v1800_v12 = vmul.f32 %v1788_v3, %v1779_v21 }
 0x25a   : > { %v2477_v26 = vpop.eup %2476 }
 0x25b   : > { %v1772_v37 = vmul.f32 %v2477_v26, %v1648_v33 }
 0x25d   : > { %v2479_v30 = vpop.eup %2478  ;;  %v1775_v42 = vadd.f32 %v1772_v37, %v1769_v31 }
 0x25e   : > { %v1780_v43 = vmul.f32 %v2479_v30, %v1750_v41 }
 0x25f   : > { %2480 = vtanh.f32 %v1775_v42  ;;  %1832 = vst [vmem:[%s3883_s2 + $0x10] sm:$0xf] %v1775_v42 }
 0x260   : > { %1828 = vst [vmem:[%s3932_s24 + $0x8] sm:$0xff] %v1780_v43  ;;  %v1801_v8 = vmul.f32 %v1793_v44, %v1780_v43 }
 0x262   : > { %v1803_v45 = vadd.f32 %v1801_v8, %v1800_v12 }
 0x265   : > { %v2481_v2 = vpop.eup %2480 }
 0x266   : > { %v1781_v47 = vmul.f32 %v2481_v2, %v1765_v50 }
 0x268   : > { %1829 = vst [vmem:[%s3932_s24 + $0x10] sm:$0xf] %v1781_v47  ;;  %v1802_v48 = vmul.f32 %v1798_v58, %v1781_v47 }
 0x269   : > { %2685 = shalt.err (!%p2682_p3)
}
 0x26a   : > { %s4166_s24 = smov 384   ;;  %v1804_v51 = vsel %vm894_vm0, %v1802_v48, 0.0  ;;  %s2700_s2 = sshra.s32 %s1928_s22, 4  ;;  %s2701_s2 = int_to_ptr.hbm [resolvable:$true] %s2700_s2 }
 0x26b   : > { %2305 = dma.vmem_to_hbm [thread:$0]  (%p2945_p10), %s1910_s9, 384, %s1912_s1, %s1848_s26, %s4143_s4, %s4166_s24, %s2804_s8  }
 0x26c   : > { %s2702_s19 = scalar_lea.hbm %s2701_s2, 24  ;;  %s2706_s12 = scalar_lea.hbm %s4165_s15, 72 }
 0x26d   : > { %p2703_p4 = scmp.ne.s32.totalorder %s2701_s2, %s2702_s19  ;;  %p2707_p6 = scmp.lt.s32.totalorder %s2701_s2, %s4165_s15 }
 0x26e   : > { %p2708_p0 = scmp.lt.s32.totalorder %s2706_s12, %s2702_s19 }
 0x26f   : > { %p2704_p5 = pnand %p2703_p4, %p2945_p10 }
 0x270   : > { %p2709_p13 = por %p2708_p0, %p2707_p6 }
 0x271   : > { %p2705_p12 = pneg %p2704_p5 }
 0x273   : > { %p2710_p7 = pnand %p2709_p13, %p2705_p12 }
 0x275   : > { %2713 = shalt.err (!%p2710_p7)
}
 0x276   : > { %2306 = dma.vmem_to_hbm [thread:$0]  (%p2945_p10), %s3962_s25, 384, %s1928_s22, %s1848_s26, %s4143_s4, %s4166_s24, %s2804_s8   ;;  %v1805_v38 = vadd.f32 %v1804_v51, %v1803_v45  ;;  %v1816_v6 = vpop.permute.xlu0 %1815 }
 0x277   : > { %s4167_s2 = sld [smem:[#allocation39_spill]]  ;;  %s706_s14 = scalar_lea.vmem [#allocation11], %s3060_s23  ;;  %v1818_v55 = vperm.slane %v1816_v6, 0 }
 0x278   : > { %v1806_v34 = vrot.slane %v1805_v38, 4  ;;  %s1864_s28 = sshll.u32 %s706_s14, 4  ;;  %s1834_s8 = scalar_lea.sflag [#allocation5], %s3060_s23  ;;  %s1865_s28 = int_to_ptr.vmem [resolvable:$true] %s1864_s28 }
 0x27a   : > { %v1807_v52 = vadd.f32 %v1806_v34, %v1805_v38 }
 0x27c   : > { %v1808_v20 = vrot.slane %v1807_v52, 2 }
 0x27d   : > { %s1862_s19 = scalar_lea.hbm %s4167_s2, %s2919_s29  ;;  %s2734_s26 = scalar_lea.hbm %s4167_s2, 3 }
 0x27e   : > { %v1809_v9 = vadd.f32 %v1808_v20, %v1807_v52  ;;  %s1866_s11 = sshll.u32 %s1862_s19, 4  ;;  %s1867_s11 = int_to_ptr.hbm [resolvable:$true] %s1866_s11 }
 0x27f   : > { %s2728_s4 = sshra.s32 %s1867_s11, 4  ;;  %s2729_s4 = int_to_ptr.hbm [resolvable:$true] %s2728_s4 }
 0x280   : > { %v1810_v53 = vrot.slane %v1809_v9, 1  ;;  %s2730_s25 = scalar_lea.hbm %s2729_s4, 1  ;;  %p2735_p2 = scmp.lt.s32.totalorder %s2729_s4, %s4167_s2 }
 0x281   : > { %p2731_p8 = scmp.ne.s32.totalorder %s2729_s4, %s2730_s25  ;;  %p2736_p3 = scmp.lt.s32.totalorder %s2734_s26, %s2730_s25 }
 0x282   : > { %v1811_v56 = vadd.f32 %v1810_v53, %v1809_v9 }
 0x283   : > { %p2732_p9 = pnand %p2731_p8, %p2945_p10  ;;  %p2737_p4 = por %p2736_p3, %p2735_p2 }
 0x284   : > { %v1819_v57 = vadd.f32 %v1818_v55, %v1811_v56 }
 0x285   : > { %p2733_p1 = pneg %p2732_p9 }
 0x286   : > { %1820 = vst [vmem:[%s706_s14] sm:$0x1] %v1819_v57 }
 0x287   : > { %p2738_p5 = pnand %p2737_p4, %p2733_p1 }
 0x289   : > { %2741 = shalt.err (!%p2738_p5)
}
 0x28a   : > { %2302 = dma.vmem_to_hbm [thread:$0]  (%p2945_p10), %s1865_s28, 16, %s1867_s11, %s1834_s8  }
 0x28b PF: > { %s4168_s23 = sld [smem:[#allocation26_spill]] }
 0x28c   : > { %s4169_s0 = sld [smem:[#allocation24_spill]] }
 0x291   : > { %p2342_p12 = scmp.ge.s32.totalorder %s4168_s23, 2 }
 0x292   : > { %s1942_s9 = sand.u32 1, %s4169_s0  }
 0x293   : > { %p2326_p6 = pnand %p2342_p12, %p2949_p11  ;;  %s1943_s1 = scalar_lea.sflag [#allocation5], %s1942_s9 }
 0x295   : > { %p2327_p0 = pneg %p2326_p6 }
 0x297   : > { %2771 = dma.done.wait (%p2327_p0), %s1943_s1, 16  }
 0x298   : > { %2773 = vsyncadd (%p2327_p0), %s1943_s1, 4294967280  ;;  %s4171_s19 = sadd.s32 4294967294, %s4168_s23  }
 0x299   : > { %s1951_s14 = sand.u32 1, %s4171_s19  }
 0x29a   : > { %s1952_s4 = scalar_lea.sflag [#allocation13], %s1951_s14 }
 0x29b   : > { %2775 = dma.done.wait (%p2327_p0), %s1952_s4, 768  }
 0x29c   : > { %2777 = vsyncadd (%p2327_p0), %s1952_s4, 4294966528  ;;  %s1972_s21 = scalar_lea.sflag [#allocation16], %s1951_s14 }
 0x29d   : > { %2779 = dma.done.wait (%p2327_p0), %s1972_s21, 768  }
 0x29e   : > { %2781 = vsyncadd (%p2327_p0), %s1972_s21, 4294966528  ;;  %s4172_s12 = sld [smem:[#allocation27_spill]]  ;;  %s4175_s26 = smov %s2788_s27 }
 0x29f   : > { %s4173_s28 = sld [smem:[#allocation25_spill]] }
 0x2a0   : > { %s4174_s11 = sld [smem:[#allocation28_spill]] }
 0x2a4   : > { %p45_p10 = scmp.ge.s32.totalorder %s4172_s12, 5  }
 0x2a5   : > { %s4176_s27 = smov %s4173_s28 }
 0x2a6   : > { %s4177_s28 = smov %s4174_s11  ;;  %47 = sbr.rel (!%p45_p10) target bundleno = 27 (0x1b), region = 221 }
 0x2ab   :  { %1988 = vsyncpa [#allocation4], 1 }
 0x2ac   :  { %1990 = vsyncpa [#allocation4 + $0x1], 1 }
 0x2ad   :  { %1991 = vsyncpa [#allocation7], 1 }
 0x2ae   :  { %1993 = vsyncpa [#allocation7 + $0x1], 1 }
 0x2af   :  { %1994 = vsyncpa [#allocation10], 1 }
 0x2b0   :  { %1996 = vsyncpa [#allocation10 + $0x1], 1 }
 0x2b1   :  { %1997 = vsyncpa [#allocation5], 1 }
 0x2b2   :  { %1999 = vsyncpa [#allocation5 + $0x1], 1 }
 0x2b3   :  { %2000 = vsyncpa [#allocation13], 1 }
 0x2b4   :  { %2002 = vsyncpa [#allocation13 + $0x1], 1 }
 0x2b5   :  { %2003 = vsyncpa [#allocation16], 1 }
 0x2b6   :  { %2005 = vsyncpa [#allocation16 + $0x1], 1 }

</bundles_post_ra>
